<compile_context>
chip_gen: v5e
topology: v5e:2x2
jax: 0.10.0
libtpu: 0.0.40
codegen_flags: <defaults>
</compile_context>

<pallas_src>
import jax
import jax.numpy as jnp
from jax import lax
from jax.experimental import pallas as pl
from jax.experimental.pallas import tpu as pltpu


def _round_up(v, m):
    return (v + m - 1) // m * m


def lstm_fused_kernel(x_ref, wih_ref, whh_ref, b_ref, wfc_ref, bfc_ref,
                      out_ref, pg_scr):
    # Padded / aligned shapes:
    #   x_ref   : (T*Bp, D_in)   time-major, batch padded to a sublane multiple
    #   wih_ref : (D_in, 4*Hp)   W_ih^T (gate-padded)
    #   whh_ref : (Hp, 4*Hp)     W_hh^T (gate-padded)
    #   b_ref   : (1, 4*Hp)      b_ih + b_hh
    #   wfc_ref : (Hp, Cp)       W_fc^T
    #   bfc_ref : (1, Cp)
    #   out_ref : (Bp, Cp)       lane-dense output slab
    #   pg_scr  : (T, Bp, 4*Hp)  precomputed input projection (VMEM scratch)
    Bp = out_ref.shape[0]
    Hp = whh_ref.shape[0]
    T = x_ref.shape[0] // Bp

    # ---- Phase 1: input projection for ALL timesteps, one big MXU matmul. ----
    # No sequential dependence -> off the serial critical path; bias folded in.
    pg = (jnp.dot(x_ref[...], wih_ref[...], preferred_element_type=jnp.float32)
          + b_ref[...])
    pg_scr[...] = pg.reshape(T, Bp, 4 * Hp)

    # ---- Phase 2: serial recurrence; only h_prev @ W_hh^T per step. ----
    def step(t, carry):
        h_prev, c_prev = carry
        gates = pg_scr[t] + jnp.dot(h_prev, whh_ref[...],
                                    preferred_element_type=jnp.float32)
        # Hp is a multiple of 128 -> each gate slice is a lane-aligned block.
        i_g = jax.nn.sigmoid(gates[:, 0 * Hp:1 * Hp])
        f_g = jax.nn.sigmoid(gates[:, 1 * Hp:2 * Hp])
        g_g = jnp.tanh(gates[:, 2 * Hp:3 * Hp])
        o_g = jax.nn.sigmoid(gates[:, 3 * Hp:4 * Hp])
        c_new = f_g * c_prev + i_g * g_g
        h_new = o_g * jnp.tanh(c_new)
        return h_new, c_new

    h0 = jnp.zeros((Bp, Hp), jnp.float32)
    c0 = jnp.zeros((Bp, Hp), jnp.float32)
    h_last, _ = lax.fori_loop(0, T, step, (h0, c0), unroll=True)

    # dropout(p=0.0) == identity; activation='relu'; fc head (lane-dense store).
    act = jnp.maximum(h_last, 0.0)
    out_ref[...] = (jnp.dot(act, wfc_ref[...], preferred_element_type=jnp.float32)
                    + bfc_ref[...]).astype(out_ref.dtype)


def lstm_model_forward(x, params, num_classes):
    """x: (B, T, D_in) float32 (batch_first, like PyTorch). -> (B, num_classes)."""
    wih_t, whh_t, b, wfc_t, bfc = params
    B, T, D_in = x.shape
    Hp = whh_t.shape[0]
    Hp4 = whh_t.shape[1]
    Cp = wfc_t.shape[1]

    Bp = max(8, _round_up(B, 8))  # f32 sublane multiple

    # batch_first -> time-major, pad batch, flatten time into the sublane dim.
    x_tm = jnp.transpose(x, (1, 0, 2))                    # (T, B, D_in)
    x_tm = jnp.pad(x_tm, ((0, 0), (0, Bp - B), (0, 0)))   # (T, Bp, D_in)
    x2d = x_tm.reshape(T * Bp, D_in)                      # (T*Bp, D_in)

    grid_spec = pltpu.PrefetchScalarGridSpec(
        num_scalar_prefetch=0,
        grid=(1,),
        in_specs=[
            pl.BlockSpec((T * Bp, D_in), lambda i: (0, 0)),   # x (all timesteps)
            pl.BlockSpec((D_in, Hp4), lambda i: (0, 0)),      # W_ih^T
            pl.BlockSpec((Hp, Hp4), lambda i: (0, 0)),        # W_hh^T
            pl.BlockSpec((1, Hp4), lambda i: (0, 0)),         # b_ih + b_hh
            pl.BlockSpec((Hp, Cp), lambda i: (0, 0)),         # W_fc^T
            pl.BlockSpec((1, Cp), lambda i: (0, 0)),          # b_fc
        ],
        out_specs=pl.BlockSpec((Bp, Cp), lambda i: (0, 0)),
        scratch_shapes=[
            pltpu.VMEM((T, Bp, Hp4), jnp.float32),            # pre-gates buffer
        ],
    )

    out_padded = pl.pallas_call(
        lstm_fused_kernel,
        out_shape=jax.ShapeDtypeStruct((Bp, Cp), jnp.float32),
        grid_spec=grid_spec,
        compiler_params=pltpu.CompilerParams(
            dimension_semantics=("arbitrary",),
            vmem_limit_bytes=32 * 1024 * 1024),
    )(x2d, wih_t, whh_t, b, wfc_t, bfc)

    return out_padded[:B, :num_classes]


def init_params(key, input_size, hidden_size, num_classes):
    """PyTorch-style init (uniform +/- 1/sqrt(H)), then zero-pad to aligned shapes.

    Zero padding is exact: padded hidden units get all-zero gate weights/bias,
    so with zero initial state their h/c remain exactly 0 and they contribute
    nothing to real units or to the fc output.
    """
    H, D_in, C = hidden_size, input_size, num_classes
    Hp = _round_up(max(H, 128), 128)
    Cp = _round_up(max(C, 128), 128)

    k = 1.0 / jnp.sqrt(hidden_size)
    keys = jax.random.split(key, 6)
    w_ih = jax.random.uniform(keys[0], (4 * H, D_in), jnp.float32, -k, k)  # lstm.weight_ih_l0
    w_hh = jax.random.uniform(keys[1], (4 * H, H), jnp.float32, -k, k)     # lstm.weight_hh_l0
    b_ih = jax.random.uniform(keys[2], (4 * H,), jnp.float32, -k, k)
    b_hh = jax.random.uniform(keys[3], (4 * H,), jnp.float32, -k, k)
    w_fc = jax.random.uniform(keys[4], (C, H), jnp.float32, -k, k)         # fc.weight
    b_fc = jax.random.uniform(keys[5], (C,), jnp.float32, -k, k)           # fc.bias

    # Gate-wise zero padding of the hidden dim (PyTorch gate order i, f, g, o).
    wih_p = jnp.zeros((4, Hp, D_in), jnp.float32).at[:, :H, :].set(
        w_ih.reshape(4, H, D_in))
    whh_p = jnp.zeros((4, Hp, Hp), jnp.float32).at[:, :H, :H].set(
        w_hh.reshape(4, H, H))
    b_p = jnp.zeros((4, Hp), jnp.float32).at[:, :H].set(
        (b_ih + b_hh).reshape(4, H))
    wfc_p = jnp.zeros((Cp, Hp), jnp.float32).at[:C, :H].set(w_fc)
    bfc_p = jnp.zeros((Cp,), jnp.float32).at[:C].set(b_fc)

    # Kernel-friendly transposed forms (keep f32 here; for realistic H cast the
    # weight matrices to bf16 and keep f32 accumulation / f32 h,c state).
    wih_t = wih_p.reshape(4 * Hp, D_in).T          # (D_in, 4*Hp)
    whh_t = whh_p.reshape(4 * Hp, Hp).T            # (Hp, 4*Hp)
    b = b_p.reshape(1, 4 * Hp)                     # (1, 4*Hp)
    wfc_t = wfc_p.T                                # (Hp, Cp)
    bfc = bfc_p.reshape(1, Cp)                     # (1, Cp)
    return (wih_t, whh_t, b, wfc_t, bfc)


if __name__ == "__main__":
    B, T, D_in, H, C = 2, 8, 16, 32, 8

    key = jax.random.PRNGKey(0)
    kx, kp = jax.random.split(key)
    x = jax.random.normal(kx, (B, T, D_in), jnp.float32)
    params = init_params(kp, D_in, H, C)

    out = lstm_model_forward(x, params, C)
    jax.block_until_ready(out)
    assert out.shape == (B, C), out.shape
    print("KERNEL_OK")
</pallas_src>

<mosaic_0001>
module attributes {stable_mosaic.version = 11 : i64} {
  func.func @lstm_fused_kernel(%arg0: i32, %arg1: memref<64x16xf32, #tpu.memory_space<vmem>>, %arg2: memref<16x512xf32, #tpu.memory_space<vmem>>, %arg3: memref<128x512xf32, #tpu.memory_space<vmem>>, %arg4: memref<1x512xf32, #tpu.memory_space<vmem>>, %arg5: memref<128x128xf32, #tpu.memory_space<vmem>>, %arg6: memref<1x128xf32, #tpu.memory_space<vmem>>, %arg7: memref<8x128xf32, #tpu.memory_space<vmem>>, %arg8: memref<8x8x512xf32, #tpu.memory_space<vmem>>) attributes {dimension_semantics = [#tpu.dimension_semantics<arbitrary>], iteration_bounds = array<i64: 1>, scalar_prefetch = 0 : i64, scratch_operands = 1 : i64, tpu.core_type = #tpu.core_type<tc>, window_params = [{pipeline_mode = #tpu.pipeline_mode<synchronous>, transform_indices = @transform_0, window_bounds = array<i64: 64, 16>}, {pipeline_mode = #tpu.pipeline_mode<synchronous>, transform_indices = @transform_1, window_bounds = array<i64: 16, 512>}, {pipeline_mode = #tpu.pipeline_mode<synchronous>, transform_indices = @transform_2, window_bounds = array<i64: 128, 512>}, {pipeline_mode = #tpu.pipeline_mode<synchronous>, transform_indices = @transform_3, window_bounds = array<i64: 1, 512>}, {pipeline_mode = #tpu.pipeline_mode<synchronous>, transform_indices = @transform_4, window_bounds = array<i64: 128, 128>}, {pipeline_mode = #tpu.pipeline_mode<synchronous>, transform_indices = @transform_5, window_bounds = array<i64: 1, 128>}, {pipeline_mode = #tpu.pipeline_mode<synchronous>, transform_indices = @transform_6, window_bounds = array<i64: 8, 128>}]} {
    %c0 = arith.constant 0 : index
    %c0_0 = arith.constant 0 : index
    %0 = vector.load %arg1[%c0, %c0_0] : memref<64x16xf32, #tpu.memory_space<vmem>>, vector<64x16xf32>
    %c0_1 = arith.constant 0 : index
    %c0_2 = arith.constant 0 : index
    %1 = vector.load %arg2[%c0_1, %c0_2] : memref<16x512xf32, #tpu.memory_space<vmem>>, vector<16x512xf32>
    %cst = arith.constant dense<0.000000e+00> : vector<64x512xf32>
    %2 = tpu.matmul %0, %1, %cst {dimension_numbers = #tpu.dot_dimension_numbers<[1], [0], [0], [1], [0, 0, 1, 1], [], []>} : vector<64x16xf32>, vector<16x512xf32>, vector<64x512xf32> -> vector<64x512xf32>
    %c0_3 = arith.constant 0 : index
    %c0_4 = arith.constant 0 : index
    %3 = vector.load %arg4[%c0_3, %c0_4] : memref<1x512xf32, #tpu.memory_space<vmem>>, vector<1x512xf32>
    %4 = vector.broadcast %3 : vector<1x512xf32> to vector<64x512xf32>
    %5 = arith.addf %2, %4 : vector<64x512xf32>
    %6 = vector.shape_cast %5 : vector<64x512xf32> to vector<8x8x512xf32>
    %c0_5 = arith.constant 0 : index
    %c0_6 = arith.constant 0 : index
    %c0_7 = arith.constant 0 : index
    %7 = vector.load %arg8[%c0_5, %c0_6, %c0_7] : memref<8x8x512xf32, #tpu.memory_space<vmem>>, vector<8x8x512xf32>
    tpu.vector_store %arg8[%c0_5, %c0_6, %c0_7], %6 {strides = array<i32>} : memref<8x8x512xf32, #tpu.memory_space<vmem>>, vector<8x8x512xf32>,
    %cst_8 = arith.constant 0.000000e+00 : f32
    %8 = vector.broadcast %cst_8 : f32 to vector<8x128xf32>
    %cst_9 = arith.constant 0.000000e+00 : f32
    %9 = vector.broadcast %cst_9 : f32 to vector<8x128xf32>
    %c0_i32 = arith.constant 0 : i32
    %10 = arith.index_cast %c0_i32 : i32 to index
    %c0_10 = arith.constant 0 : index
    %c0_11 = arith.constant 0 : index
    %11 = vector.load %arg8[%10, %c0_10, %c0_11] : memref<8x8x512xf32, #tpu.memory_space<vmem>>, vector<1x8x512xf32>
    %12 = vector.shape_cast %11 : vector<1x8x512xf32> to vector<8x512xf32>
    %c0_12 = arith.constant 0 : index
    %c0_13 = arith.constant 0 : index
    %13 = vector.load %arg3[%c0_12, %c0_13] : memref<128x512xf32, #tpu.memory_space<vmem>>, vector<128x512xf32>
    %cst_14 = arith.constant dense<0.000000e+00> : vector<8x512xf32>
    %14 = tpu.matmul %8, %13, %cst_14 {dimension_numbers = #tpu.dot_dimension_numbers<[1], [0], [0], [1], [0, 0, 1, 1], [], []>} : vector<8x128xf32>, vector<128x512xf32>, vector<8x512xf32> -> vector<8x512xf32>
    %15 = arith.addf %12, %14 : vector<8x512xf32>
    %16 = vector.extract_strided_slice %15 {offsets = [0, 0], sizes = [8, 128], strides = [1, 1]} : vector<8x512xf32> to vector<8x128xf32>
    %17 = arith.negf %16 : vector<8x128xf32>
    %18 = math.exp %17 : vector<8x128xf32>
    %cst_15 = arith.constant 1.000000e+00 : f32
    %19 = vector.broadcast %cst_15 : f32 to vector<8x128xf32>
    %20 = arith.addf %19, %18 : vector<8x128xf32>
    %21 = arith.divf %19, %20 : vector<8x128xf32>
    %22 = vector.extract_strided_slice %15 {offsets = [0, 128], sizes = [8, 128], strides = [1, 1]} : vector<8x512xf32> to vector<8x128xf32>
    %23 = arith.negf %22 : vector<8x128xf32>
    %24 = math.exp %23 : vector<8x128xf32>
    %cst_16 = arith.constant 1.000000e+00 : f32
    %25 = vector.broadcast %cst_16 : f32 to vector<8x128xf32>
    %26 = arith.addf %25, %24 : vector<8x128xf32>
    %27 = arith.divf %25, %26 : vector<8x128xf32>
    %28 = vector.extract_strided_slice %15 {offsets = [0, 256], sizes = [8, 128], strides = [1, 1]} : vector<8x512xf32> to vector<8x128xf32>
    %29 = math.tanh %28 : vector<8x128xf32>
    %30 = vector.extract_strided_slice %15 {offsets = [0, 384], sizes = [8, 128], strides = [1, 1]} : vector<8x512xf32> to vector<8x128xf32>
    %31 = arith.negf %30 : vector<8x128xf32>
    %32 = math.exp %31 : vector<8x128xf32>
    %cst_17 = arith.constant 1.000000e+00 : f32
    %33 = vector.broadcast %cst_17 : f32 to vector<8x128xf32>
    %34 = arith.addf %33, %32 : vector<8x128xf32>
    %35 = arith.divf %33, %34 : vector<8x128xf32>
    %36 = arith.mulf %27, %9 : vector<8x128xf32>
    %37 = arith.mulf %21, %29 : vector<8x128xf32>
    %38 = arith.addf %36, %37 : vector<8x128xf32>
    %39 = math.tanh %38 : vector<8x128xf32>
    %40 = arith.mulf %35, %39 : vector<8x128xf32>
    %c1_i32 = arith.constant 1 : i32
    %41 = arith.index_cast %c1_i32 : i32 to index
    %c0_18 = arith.constant 0 : index
    %c0_19 = arith.constant 0 : index
    %42 = vector.load %arg8[%41, %c0_18, %c0_19] : memref<8x8x512xf32, #tpu.memory_space<vmem>>, vector<1x8x512xf32>
    %43 = vector.shape_cast %42 : vector<1x8x512xf32> to vector<8x512xf32>
    %c0_20 = arith.constant 0 : index
    %c0_21 = arith.constant 0 : index
    %44 = vector.load %arg3[%c0_20, %c0_21] : memref<128x512xf32, #tpu.memory_space<vmem>>, vector<128x512xf32>
    %cst_22 = arith.constant dense<0.000000e+00> : vector<8x512xf32>
    %45 = tpu.matmul %40, %44, %cst_22 {dimension_numbers = #tpu.dot_dimension_numbers<[1], [0], [0], [1], [0, 0, 1, 1], [], []>} : vector<8x128xf32>, vector<128x512xf32>, vector<8x512xf32> -> vector<8x512xf32>
    %46 = arith.addf %43, %45 : vector<8x512xf32>
    %47 = vector.extract_strided_slice %46 {offsets = [0, 0], sizes = [8, 128], strides = [1, 1]} : vector<8x512xf32> to vector<8x128xf32>
    %48 = arith.negf %47 : vector<8x128xf32>
    %49 = math.exp %48 : vector<8x128xf32>
    %cst_23 = arith.constant 1.000000e+00 : f32
    %50 = vector.broadcast %cst_23 : f32 to vector<8x128xf32>
    %51 = arith.addf %50, %49 : vector<8x128xf32>
    %52 = arith.divf %50, %51 : vector<8x128xf32>
    %53 = vector.extract_strided_slice %46 {offsets = [0, 128], sizes = [8, 128], strides = [1, 1]} : vector<8x512xf32> to vector<8x128xf32>
    %54 = arith.negf %53 : vector<8x128xf32>
    %55 = math.exp %54 : vector<8x128xf32>
    %cst_24 = arith.constant 1.000000e+00 : f32
    %56 = vector.broadcast %cst_24 : f32 to vector<8x128xf32>
    %57 = arith.addf %56, %55 : vector<8x128xf32>
    %58 = arith.divf %56, %57 : vector<8x128xf32>
    %59 = vector.extract_strided_slice %46 {offsets = [0, 256], sizes = [8, 128], strides = [1, 1]} : vector<8x512xf32> to vector<8x128xf32>
    %60 = math.tanh %59 : vector<8x128xf32>
    %61 = vector.extract_strided_slice %46 {offsets = [0, 384], sizes = [8, 128], strides = [1, 1]} : vector<8x512xf32> to vector<8x128xf32>
    %62 = arith.negf %61 : vector<8x128xf32>
    %63 = math.exp %62 : vector<8x128xf32>
    %cst_25 = arith.constant 1.000000e+00 : f32
    %64 = vector.broadcast %cst_25 : f32 to vector<8x128xf32>
    %65 = arith.addf %64, %63 : vector<8x128xf32>
    %66 = arith.divf %64, %65 : vector<8x128xf32>
    %67 = arith.mulf %58, %38 : vector<8x128xf32>
    %68 = arith.mulf %52, %60 : vector<8x128xf32>
    %69 = arith.addf %67, %68 : vector<8x128xf32>
    %70 = math.tanh %69 : vector<8x128xf32>
    %71 = arith.mulf %66, %70 : vector<8x128xf32>
    %c2_i32 = arith.constant 2 : i32
    %72 = arith.index_cast %c2_i32 : i32 to index
    %c0_26 = arith.constant 0 : index
    %c0_27 = arith.constant 0 : index
    %73 = vector.load %arg8[%72, %c0_26, %c0_27] : memref<8x8x512xf32, #tpu.memory_space<vmem>>, vector<1x8x512xf32>
    %74 = vector.shape_cast %73 : vector<1x8x512xf32> to vector<8x512xf32>
    %c0_28 = arith.constant 0 : index
    %c0_29 = arith.constant 0 : index
    %75 = vector.load %arg3[%c0_28, %c0_29] : memref<128x512xf32, #tpu.memory_space<vmem>>, vector<128x512xf32>
    %cst_30 = arith.constant dense<0.000000e+00> : vector<8x512xf32>
    %76 = tpu.matmul %71, %75, %cst_30 {dimension_numbers = #tpu.dot_dimension_numbers<[1], [0], [0], [1], [0, 0, 1, 1], [], []>} : vector<8x128xf32>, vector<128x512xf32>, vector<8x512xf32> -> vector<8x512xf32>
    %77 = arith.addf %74, %76 : vector<8x512xf32>
    %78 = vector.extract_strided_slice %77 {offsets = [0, 0], sizes = [8, 128], strides = [1, 1]} : vector<8x512xf32> to vector<8x128xf32>
    %79 = arith.negf %78 : vector<8x128xf32>
    %80 = math.exp %79 : vector<8x128xf32>
    %cst_31 = arith.constant 1.000000e+00 : f32
    %81 = vector.broadcast %cst_31 : f32 to vector<8x128xf32>
    %82 = arith.addf %81, %80 : vector<8x128xf32>
    %83 = arith.divf %81, %82 : vector<8x128xf32>
    %84 = vector.extract_strided_slice %77 {offsets = [0, 128], sizes = [8, 128], strides = [1, 1]} : vector<8x512xf32> to vector<8x128xf32>
    %85 = arith.negf %84 : vector<8x128xf32>
    %86 = math.exp %85 : vector<8x128xf32>
    %cst_32 = arith.constant 1.000000e+00 : f32
    %87 = vector.broadcast %cst_32 : f32 to vector<8x128xf32>
    %88 = arith.addf %87, %86 : vector<8x128xf32>
    %89 = arith.divf %87, %88 : vector<8x128xf32>
    %90 = vector.extract_strided_slice %77 {offsets = [0, 256], sizes = [8, 128], strides = [1, 1]} : vector<8x512xf32> to vector<8x128xf32>
    %91 = math.tanh %90 : vector<8x128xf32>
    %92 = vector.extract_strided_slice %77 {offsets = [0, 384], sizes = [8, 128], strides = [1, 1]} : vector<8x512xf32> to vector<8x128xf32>
    %93 = arith.negf %92 : vector<8x128xf32>
    %94 = math.exp %93 : vector<8x128xf32>
    %cst_33 = arith.constant 1.000000e+00 : f32
    %95 = vector.broadcast %cst_33 : f32 to vector<8x128xf32>
    %96 = arith.addf %95, %94 : vector<8x128xf32>
    %97 = arith.divf %95, %96 : vector<8x128xf32>
    %98 = arith.mulf %89, %69 : vector<8x128xf32>
    %99 = arith.mulf %83, %91 : vector<8x128xf32>
    %100 = arith.addf %98, %99 : vector<8x128xf32>
    %101 = math.tanh %100 : vector<8x128xf32>
    %102 = arith.mulf %97, %101 : vector<8x128xf32>
    %c3_i32 = arith.constant 3 : i32
    %103 = arith.index_cast %c3_i32 : i32 to index
    %c0_34 = arith.constant 0 : index
    %c0_35 = arith.constant 0 : index
    %104 = vector.load %arg8[%103, %c0_34, %c0_35] : memref<8x8x512xf32, #tpu.memory_space<vmem>>, vector<1x8x512xf32>
    %105 = vector.shape_cast %104 : vector<1x8x512xf32> to vector<8x512xf32>
    %c0_36 = arith.constant 0 : index
    %c0_37 = arith.constant 0 : index
    %106 = vector.load %arg3[%c0_36, %c0_37] : memref<128x512xf32, #tpu.memory_space<vmem>>, vector<128x512xf32>
    %cst_38 = arith.constant dense<0.000000e+00> : vector<8x512xf32>
    %107 = tpu.matmul %102, %106, %cst_38 {dimension_numbers = #tpu.dot_dimension_numbers<[1], [0], [0], [1], [0, 0, 1, 1], [], []>} : vector<8x128xf32>, vector<128x512xf32>, vector<8x512xf32> -> vector<8x512xf32>
    %108 = arith.addf %105, %107 : vector<8x512xf32>
    %109 = vector.extract_strided_slice %108 {offsets = [0, 0], sizes = [8, 128], strides = [1, 1]} : vector<8x512xf32> to vector<8x128xf32>
    %110 = arith.negf %109 : vector<8x128xf32>
    %111 = math.exp %110 : vector<8x128xf32>
    %cst_39 = arith.constant 1.000000e+00 : f32
    %112 = vector.broadcast %cst_39 : f32 to vector<8x128xf32>
    %113 = arith.addf %112, %111 : vector<8x128xf32>
    %114 = arith.divf %112, %113 : vector<8x128xf32>
    %115 = vector.extract_strided_slice %108 {offsets = [0, 128], sizes = [8, 128], strides = [1, 1]} : vector<8x512xf32> to vector<8x128xf32>
    %116 = arith.negf %115 : vector<8x128xf32>
    %117 = math.exp %116 : vector<8x128xf32>
    %cst_40 = arith.constant 1.000000e+00 : f32
    %118 = vector.broadcast %cst_40 : f32 to vector<8x128xf32>
    %119 = arith.addf %118, %117 : vector<8x128xf32>
    %120 = arith.divf %118, %119 : vector<8x128xf32>
    %121 = vector.extract_strided_slice %108 {offsets = [0, 256], sizes = [8, 128], strides = [1, 1]} : vector<8x512xf32> to vector<8x128xf32>
    %122 = math.tanh %121 : vector<8x128xf32>
    %123 = vector.extract_strided_slice %108 {offsets = [0, 384], sizes = [8, 128], strides = [1, 1]} : vector<8x512xf32> to vector<8x128xf32>
    %124 = arith.negf %123 : vector<8x128xf32>
    %125 = math.exp %124 : vector<8x128xf32>
    %cst_41 = arith.constant 1.000000e+00 : f32
    %126 = vector.broadcast %cst_41 : f32 to vector<8x128xf32>
    %127 = arith.addf %126, %125 : vector<8x128xf32>
    %128 = arith.divf %126, %127 : vector<8x128xf32>
    %129 = arith.mulf %120, %100 : vector<8x128xf32>
    %130 = arith.mulf %114, %122 : vector<8x128xf32>
    %131 = arith.addf %129, %130 : vector<8x128xf32>
    %132 = math.tanh %131 : vector<8x128xf32>
    %133 = arith.mulf %128, %132 : vector<8x128xf32>
    %c4_i32 = arith.constant 4 : i32
    %134 = arith.index_cast %c4_i32 : i32 to index
    %c0_42 = arith.constant 0 : index
    %c0_43 = arith.constant 0 : index
    %135 = vector.load %arg8[%134, %c0_42, %c0_43] : memref<8x8x512xf32, #tpu.memory_space<vmem>>, vector<1x8x512xf32>
    %136 = vector.shape_cast %135 : vector<1x8x512xf32> to vector<8x512xf32>
    %c0_44 = arith.constant 0 : index
    %c0_45 = arith.constant 0 : index
    %137 = vector.load %arg3[%c0_44, %c0_45] : memref<128x512xf32, #tpu.memory_space<vmem>>, vector<128x512xf32>
    %cst_46 = arith.constant dense<0.000000e+00> : vector<8x512xf32>
    %138 = tpu.matmul %133, %137, %cst_46 {dimension_numbers = #tpu.dot_dimension_numbers<[1], [0], [0], [1], [0, 0, 1, 1], [], []>} : vector<8x128xf32>, vector<128x512xf32>, vector<8x512xf32> -> vector<8x512xf32>
    %139 = arith.addf %136, %138 : vector<8x512xf32>
    %140 = vector.extract_strided_slice %139 {offsets = [0, 0], sizes = [8, 128], strides = [1, 1]} : vector<8x512xf32> to vector<8x128xf32>
    %141 = arith.negf %140 : vector<8x128xf32>
    %142 = math.exp %141 : vector<8x128xf32>
    %cst_47 = arith.constant 1.000000e+00 : f32
    %143 = vector.broadcast %cst_47 : f32 to vector<8x128xf32>
    %144 = arith.addf %143, %142 : vector<8x128xf32>
    %145 = arith.divf %143, %144 : vector<8x128xf32>
    %146 = vector.extract_strided_slice %139 {offsets = [0, 128], sizes = [8, 128], strides = [1, 1]} : vector<8x512xf32> to vector<8x128xf32>
    %147 = arith.negf %146 : vector<8x128xf32>
    %148 = math.exp %147 : vector<8x128xf32>
    %cst_48 = arith.constant 1.000000e+00 : f32
    %149 = vector.broadcast %cst_48 : f32 to vector<8x128xf32>
    %150 = arith.addf %149, %148 : vector<8x128xf32>
    %151 = arith.divf %149, %150 : vector<8x128xf32>
    %152 = vector.extract_strided_slice %139 {offsets = [0, 256], sizes = [8, 128], strides = [1, 1]} : vector<8x512xf32> to vector<8x128xf32>
    %153 = math.tanh %152 : vector<8x128xf32>
    %154 = vector.extract_strided_slice %139 {offsets = [0, 384], sizes = [8, 128], strides = [1, 1]} : vector<8x512xf32> to vector<8x128xf32>
    %155 = arith.negf %154 : vector<8x128xf32>
    %156 = math.exp %155 : vector<8x128xf32>
    %cst_49 = arith.constant 1.000000e+00 : f32
    %157 = vector.broadcast %cst_49 : f32 to vector<8x128xf32>
    %158 = arith.addf %157, %156 : vector<8x128xf32>
    %159 = arith.divf %157, %158 : vector<8x128xf32>
    %160 = arith.mulf %151, %131 : vector<8x128xf32>
    %161 = arith.mulf %145, %153 : vector<8x128xf32>
    %162 = arith.addf %160, %161 : vector<8x128xf32>
    %163 = math.tanh %162 : vector<8x128xf32>
    %164 = arith.mulf %159, %163 : vector<8x128xf32>
    %c5_i32 = arith.constant 5 : i32
    %165 = arith.index_cast %c5_i32 : i32 to index
    %c0_50 = arith.constant 0 : index
    %c0_51 = arith.constant 0 : index
    %166 = vector.load %arg8[%165, %c0_50, %c0_51] : memref<8x8x512xf32, #tpu.memory_space<vmem>>, vector<1x8x512xf32>
    %167 = vector.shape_cast %166 : vector<1x8x512xf32> to vector<8x512xf32>
    %c0_52 = arith.constant 0 : index
    %c0_53 = arith.constant 0 : index
    %168 = vector.load %arg3[%c0_52, %c0_53] : memref<128x512xf32, #tpu.memory_space<vmem>>, vector<128x512xf32>
    %cst_54 = arith.constant dense<0.000000e+00> : vector<8x512xf32>
    %169 = tpu.matmul %164, %168, %cst_54 {dimension_numbers = #tpu.dot_dimension_numbers<[1], [0], [0], [1], [0, 0, 1, 1], [], []>} : vector<8x128xf32>, vector<128x512xf32>, vector<8x512xf32> -> vector<8x512xf32>
    %170 = arith.addf %167, %169 : vector<8x512xf32>
    %171 = vector.extract_strided_slice %170 {offsets = [0, 0], sizes = [8, 128], strides = [1, 1]} : vector<8x512xf32> to vector<8x128xf32>
    %172 = arith.negf %171 : vector<8x128xf32>
    %173 = math.exp %172 : vector<8x128xf32>
    %cst_55 = arith.constant 1.000000e+00 : f32
    %174 = vector.broadcast %cst_55 : f32 to vector<8x128xf32>
    %175 = arith.addf %174, %173 : vector<8x128xf32>
    %176 = arith.divf %174, %175 : vector<8x128xf32>
    %177 = vector.extract_strided_slice %170 {offsets = [0, 128], sizes = [8, 128], strides = [1, 1]} : vector<8x512xf32> to vector<8x128xf32>
    %178 = arith.negf %177 : vector<8x128xf32>
    %179 = math.exp %178 : vector<8x128xf32>
    %cst_56 = arith.constant 1.000000e+00 : f32
    %180 = vector.broadcast %cst_56 : f32 to vector<8x128xf32>
    %181 = arith.addf %180, %179 : vector<8x128xf32>
    %182 = arith.divf %180, %181 : vector<8x128xf32>
    %183 = vector.extract_strided_slice %170 {offsets = [0, 256], sizes = [8, 128], strides = [1, 1]} : vector<8x512xf32> to vector<8x128xf32>
    %184 = math.tanh %183 : vector<8x128xf32>
    %185 = vector.extract_strided_slice %170 {offsets = [0, 384], sizes = [8, 128], strides = [1, 1]} : vector<8x512xf32> to vector<8x128xf32>
    %186 = arith.negf %185 : vector<8x128xf32>
    %187 = math.exp %186 : vector<8x128xf32>
    %cst_57 = arith.constant 1.000000e+00 : f32
    %188 = vector.broadcast %cst_57 : f32 to vector<8x128xf32>
    %189 = arith.addf %188, %187 : vector<8x128xf32>
    %190 = arith.divf %188, %189 : vector<8x128xf32>
    %191 = arith.mulf %182, %162 : vector<8x128xf32>
    %192 = arith.mulf %176, %184 : vector<8x128xf32>
    %193 = arith.addf %191, %192 : vector<8x128xf32>
    %194 = math.tanh %193 : vector<8x128xf32>
    %195 = arith.mulf %190, %194 : vector<8x128xf32>
    %c6_i32 = arith.constant 6 : i32
    %196 = arith.index_cast %c6_i32 : i32 to index
    %c0_58 = arith.constant 0 : index
    %c0_59 = arith.constant 0 : index
    %197 = vector.load %arg8[%196, %c0_58, %c0_59] : memref<8x8x512xf32, #tpu.memory_space<vmem>>, vector<1x8x512xf32>
    %198 = vector.shape_cast %197 : vector<1x8x512xf32> to vector<8x512xf32>
    %c0_60 = arith.constant 0 : index
    %c0_61 = arith.constant 0 : index
    %199 = vector.load %arg3[%c0_60, %c0_61] : memref<128x512xf32, #tpu.memory_space<vmem>>, vector<128x512xf32>
    %cst_62 = arith.constant dense<0.000000e+00> : vector<8x512xf32>
    %200 = tpu.matmul %195, %199, %cst_62 {dimension_numbers = #tpu.dot_dimension_numbers<[1], [0], [0], [1], [0, 0, 1, 1], [], []>} : vector<8x128xf32>, vector<128x512xf32>, vector<8x512xf32> -> vector<8x512xf32>
    %201 = arith.addf %198, %200 : vector<8x512xf32>
    %202 = vector.extract_strided_slice %201 {offsets = [0, 0], sizes = [8, 128], strides = [1, 1]} : vector<8x512xf32> to vector<8x128xf32>
    %203 = arith.negf %202 : vector<8x128xf32>
    %204 = math.exp %203 : vector<8x128xf32>
    %cst_63 = arith.constant 1.000000e+00 : f32
    %205 = vector.broadcast %cst_63 : f32 to vector<8x128xf32>
    %206 = arith.addf %205, %204 : vector<8x128xf32>
    %207 = arith.divf %205, %206 : vector<8x128xf32>
    %208 = vector.extract_strided_slice %201 {offsets = [0, 128], sizes = [8, 128], strides = [1, 1]} : vector<8x512xf32> to vector<8x128xf32>
    %209 = arith.negf %208 : vector<8x128xf32>
    %210 = math.exp %209 : vector<8x128xf32>
    %cst_64 = arith.constant 1.000000e+00 : f32
    %211 = vector.broadcast %cst_64 : f32 to vector<8x128xf32>
    %212 = arith.addf %211, %210 : vector<8x128xf32>
    %213 = arith.divf %211, %212 : vector<8x128xf32>
    %214 = vector.extract_strided_slice %201 {offsets = [0, 256], sizes = [8, 128], strides = [1, 1]} : vector<8x512xf32> to vector<8x128xf32>
    %215 = math.tanh %214 : vector<8x128xf32>
    %216 = vector.extract_strided_slice %201 {offsets = [0, 384], sizes = [8, 128], strides = [1, 1]} : vector<8x512xf32> to vector<8x128xf32>
    %217 = arith.negf %216 : vector<8x128xf32>
    %218 = math.exp %217 : vector<8x128xf32>
    %cst_65 = arith.constant 1.000000e+00 : f32
    %219 = vector.broadcast %cst_65 : f32 to vector<8x128xf32>
    %220 = arith.addf %219, %218 : vector<8x128xf32>
    %221 = arith.divf %219, %220 : vector<8x128xf32>
    %222 = arith.mulf %213, %193 : vector<8x128xf32>
    %223 = arith.mulf %207, %215 : vector<8x128xf32>
    %224 = arith.addf %222, %223 : vector<8x128xf32>
    %225 = math.tanh %224 : vector<8x128xf32>
    %226 = arith.mulf %221, %225 : vector<8x128xf32>
    %c7_i32 = arith.constant 7 : i32
    %227 = arith.index_cast %c7_i32 : i32 to index
    %c0_66 = arith.constant 0 : index
    %c0_67 = arith.constant 0 : index
    %228 = vector.load %arg8[%227, %c0_66, %c0_67] : memref<8x8x512xf32, #tpu.memory_space<vmem>>, vector<1x8x512xf32>
    %229 = vector.shape_cast %228 : vector<1x8x512xf32> to vector<8x512xf32>
    %c0_68 = arith.constant 0 : index
    %c0_69 = arith.constant 0 : index
    %230 = vector.load %arg3[%c0_68, %c0_69] : memref<128x512xf32, #tpu.memory_space<vmem>>, vector<128x512xf32>
    %cst_70 = arith.constant dense<0.000000e+00> : vector<8x512xf32>
    %231 = tpu.matmul %226, %230, %cst_70 {dimension_numbers = #tpu.dot_dimension_numbers<[1], [0], [0], [1], [0, 0, 1, 1], [], []>} : vector<8x128xf32>, vector<128x512xf32>, vector<8x512xf32> -> vector<8x512xf32>
    %232 = arith.addf %229, %231 : vector<8x512xf32>
    %233 = vector.extract_strided_slice %232 {offsets = [0, 0], sizes = [8, 128], strides = [1, 1]} : vector<8x512xf32> to vector<8x128xf32>
    %234 = arith.negf %233 : vector<8x128xf32>
    %235 = math.exp %234 : vector<8x128xf32>
    %cst_71 = arith.constant 1.000000e+00 : f32
    %236 = vector.broadcast %cst_71 : f32 to vector<8x128xf32>
    %237 = arith.addf %236, %235 : vector<8x128xf32>
    %238 = arith.divf %236, %237 : vector<8x128xf32>
    %239 = vector.extract_strided_slice %232 {offsets = [0, 128], sizes = [8, 128], strides = [1, 1]} : vector<8x512xf32> to vector<8x128xf32>
    %240 = arith.negf %239 : vector<8x128xf32>
    %241 = math.exp %240 : vector<8x128xf32>
    %cst_72 = arith.constant 1.000000e+00 : f32
    %242 = vector.broadcast %cst_72 : f32 to vector<8x128xf32>
    %243 = arith.addf %242, %241 : vector<8x128xf32>
    %244 = arith.divf %242, %243 : vector<8x128xf32>
    %245 = vector.extract_strided_slice %232 {offsets = [0, 256], sizes = [8, 128], strides = [1, 1]} : vector<8x512xf32> to vector<8x128xf32>
    %246 = math.tanh %245 : vector<8x128xf32>
    %247 = vector.extract_strided_slice %232 {offsets = [0, 384], sizes = [8, 128], strides = [1, 1]} : vector<8x512xf32> to vector<8x128xf32>
    %248 = arith.negf %247 : vector<8x128xf32>
    %249 = math.exp %248 : vector<8x128xf32>
    %cst_73 = arith.constant 1.000000e+00 : f32
    %250 = vector.broadcast %cst_73 : f32 to vector<8x128xf32>
    %251 = arith.addf %250, %249 : vector<8x128xf32>
    %252 = arith.divf %250, %251 : vector<8x128xf32>
    %253 = arith.mulf %244, %224 : vector<8x128xf32>
    %254 = arith.mulf %238, %246 : vector<8x128xf32>
    %255 = arith.addf %253, %254 : vector<8x128xf32>
    %256 = math.tanh %255 : vector<8x128xf32>
    %257 = arith.mulf %252, %256 : vector<8x128xf32>
    %c8_i32 = arith.constant 8 : i32
    %cst_74 = arith.constant 0.000000e+00 : f32
    %258 = vector.broadcast %cst_74 : f32 to vector<8x128xf32>
    %259 = arith.maximumf %257, %258 : vector<8x128xf32>
    %c0_75 = arith.constant 0 : index
    %c0_76 = arith.constant 0 : index
    %260 = vector.load %arg5[%c0_75, %c0_76] : memref<128x128xf32, #tpu.memory_space<vmem>>, vector<128x128xf32>
    %cst_77 = arith.constant dense<0.000000e+00> : vector<8x128xf32>
    %261 = tpu.matmul %259, %260, %cst_77 {dimension_numbers = #tpu.dot_dimension_numbers<[1], [0], [0], [1], [0, 0, 1, 1], [], []>} : vector<8x128xf32>, vector<128x128xf32>, vector<8x128xf32> -> vector<8x128xf32>
    %c0_78 = arith.constant 0 : index
    %c0_79 = arith.constant 0 : index
    %262 = vector.load %arg6[%c0_78, %c0_79] : memref<1x128xf32, #tpu.memory_space<vmem>>, vector<1x128xf32>
    %263 = vector.broadcast %262 : vector<1x128xf32> to vector<8x128xf32>
    %264 = arith.addf %261, %263 : vector<8x128xf32>
    %c0_80 = arith.constant 0 : index
    %c0_81 = arith.constant 0 : index
    %265 = vector.load %arg7[%c0_80, %c0_81] : memref<8x128xf32, #tpu.memory_space<vmem>>, vector<8x128xf32>
    tpu.vector_store %arg7[%c0_80, %c0_81], %264 {strides = array<i32>} : memref<8x128xf32, #tpu.memory_space<vmem>>, vector<8x128xf32>,
    return
  }
  func.func @transform_0(%arg0: i32) -> (i32, i32) {
    %c0_i32 = arith.constant 0 : i32
    %c0_i32_0 = arith.constant 0 : i32
    %c0_i32_1 = arith.constant 0 : i32
    return %c0_i32, %c0_i32_0 : i32, i32
  }
  func.func @transform_1(%arg0: i32) -> (i32, i32) {
    %c0_i32 = arith.constant 0 : i32
    %c0_i32_0 = arith.constant 0 : i32
    %c0_i32_1 = arith.constant 0 : i32
    return %c0_i32, %c0_i32_0 : i32, i32
  }
  func.func @transform_2(%arg0: i32) -> (i32, i32) {
    %c0_i32 = arith.constant 0 : i32
    %c0_i32_0 = arith.constant 0 : i32
    %c0_i32_1 = arith.constant 0 : i32
    return %c0_i32, %c0_i32_0 : i32, i32
  }
  func.func @transform_3(%arg0: i32) -> (i32, i32) {
    %c0_i32 = arith.constant 0 : i32
    %c0_i32_0 = arith.constant 0 : i32
    %c0_i32_1 = arith.constant 0 : i32
    return %c0_i32, %c0_i32_0 : i32, i32
  }
  func.func @transform_4(%arg0: i32) -> (i32, i32) {
    %c0_i32 = arith.constant 0 : i32
    %c0_i32_0 = arith.constant 0 : i32
    %c0_i32_1 = arith.constant 0 : i32
    return %c0_i32, %c0_i32_0 : i32, i32
  }
  func.func @transform_5(%arg0: i32) -> (i32, i32) {
    %c0_i32 = arith.constant 0 : i32
    %c0_i32_0 = arith.constant 0 : i32
    %c0_i32_1 = arith.constant 0 : i32
    return %c0_i32, %c0_i32_0 : i32, i32
  }
  func.func @transform_6(%arg0: i32) -> (i32, i32) {
    %c0_i32 = arith.constant 0 : i32
    %c0_i32_0 = arith.constant 0 : i32
    %c0_i32_1 = arith.constant 0 : i32
    return %c0_i32, %c0_i32_0 : i32, i32
  }
}

</mosaic_0001>

<bundles_post_ra>
// kernel: tpu_custom_call.1
= control target key start
LH: loop header
LB: loop body
LE: loop exit
PB: predicated region body
PF: predicated region fallthrough
CT: control target
= control target key end

     0   :  { %11 = vsyncpa [#allocation4], 0  ;;  %s3039_s0 = inlined_call_operand.vmem [shape: f32[64,16], index: 0, kind: input, shape index: {}]   ;;  %s3040_s1 = inlined_call_operand.vmem [shape: f32[16,512], index: 1, kind: input, shape index: {}]   ;;  %s3041_s2 = inlined_call_operand.hbm [shape: f32[128,512], index: 2, kind: input, shape index: {}]   ;;  %s3042_s3 = inlined_call_operand.vmem [shape: f32[1,512], index: 3, kind: input, shape index: {}]   ;;  %s3043_s4 = inlined_call_operand.hbm [shape: f32[128,128], index: 4, kind: input, shape index: {}]   ;;  %s3044_s5 = inlined_call_operand.vmem [shape: f32[1,128], index: 5, kind: input, shape index: {}]   ;;  %s3045_s6 = inlined_call_operand.hbm [shape: f32[8,128], index: 6, kind: output, shape index: {}]  }
   0x1   :  { %12 = vsyncpa [#allocation7], 0 }
   0x2   :  { %13 = vsyncpa [#allocation5], 0  ;;  %s22_s23 = sshll.u32 %s3041_s2, 4  ;;  %s1983_s24 = smov [#allocation3]   ;;  %s23_s23 = int_to_ptr.hbm [resolvable:$true] %s22_s23 }
   0x3   :  { %s24_s25 = sshll.u32 %s1983_s24, 4  ;;  %s37_s28 = sshll.u32 %s3043_s4, 4  ;;  %s25_s25 = int_to_ptr.vmem [resolvable:$true] %s24_s25  ;;  %s38_s28 = int_to_ptr.hbm [resolvable:$true] %s37_s28 }
   0x4   :  { %s1984_s29 = smov 512   ;;  %s1985_s30 = smov 32  }
   0x5   :  { %30 = dma.hbm_to_vmem [thread:$0]  %s23_s23, 8192, %s25_s25, [#allocation4], %s1984_s29, %s1984_s29, %s1985_s30  }
   0x6   :  { %s1986_s7 = smov [#allocation6]   ;;  %s1987_s9 = smov 128  }
   0x7   :  { %s39_s8 = sshll.u32 %s1986_s7, 4  ;;  %s1988_s10 = smov 8   ;;  %s40_s8 = int_to_ptr.vmem [resolvable:$true] %s39_s8 }
   0x8   :  { %45 = dma.hbm_to_vmem [thread:$0]  %s38_s28, 2048, %s40_s8, [#allocation7], %s1987_s9, %s1987_s9, %s1988_s10  }
   0x9   :  { %1977 = dma.done.wait [#allocation4], 8192  }
   0xa   :  { %1978 = vsyncadd [#allocation4], 4294959104 }
   0xb   :  { %1979 = dma.done.wait [#allocation7], 2048  }
   0xc   :  { %1980 = vsyncadd [#allocation7], 4294965248  ;;  %v68_v0 = vld [vmem:[%s3040_s1 + $0x20] sm:$0xff]  ;;  %vm82_vm0 = vcmask 130048   ;;  %v2044_v3 = vld [vmem:[%s3039_s0 + $0x28] sm:$0xff]  ;;  %s1990_s16 = smov [#allocation8]  }
   0xd   :  { %v64_v1 = vld [vmem:[%s3040_s1] sm:$0xff]  ;;  %121 = vmatpush.msra.mxu0 %v68_v0  ;;  %1698 = vmatpush.msra.mxu1 %v68_v0  ;;  %v2049_v4 = vld [vmem:[%s3039_s0 + $0x30] sm:$0xff]  ;;  %v2054_v5 = vld [vmem:[%s3039_s0 + $0x38] sm:$0xff]  ;;  %s1629_s17 = sshll.u32 %s1990_s16, 4  ;;  %s1631_s20 = sshll.u32 %s3045_s6, 4  ;;  %s1630_s17 = int_to_ptr.vmem [resolvable:$true] %s1629_s17  ;;  %s1632_s20 = int_to_ptr.hbm [resolvable:$true] %s1631_s20 }
   0xe   :  { %1699 = vmatpush.msra.mxu2 %v68_v0  ;;  %1700 = vmatpush.msra.mxu3 %v68_v0  ;;  %v56_v2 = vld [vmem:[%s3039_s0] sm:$0xff]  ;;  %v69_v6 = vld [vmem:[%s3040_s1 + $0x28] sm:$0xff]  ;;  %v70_v7 = vld [vmem:[%s3040_s1 + $0x30] sm:$0xff] }
   0xf   :  { %122 = vmatpush.msra.mxu0 %v64_v1  ;;  %1701 = vmatpush.msra.mxu1 %v64_v1  ;;  %v71_v8 = vld [vmem:[%s3040_s1 + $0x38] sm:$0xff]  ;;  %v2068_v9 = vld [vmem:[#allocation3 + $0x1e0] sm:$0xff]  ;;  %v65_v10 = vld [vmem:[%s3040_s1 + $0x8] sm:$0xff] }
  0x10   :  { %1702 = vmatpush.msra.mxu2 %v64_v1  ;;  %1703 = vmatpush.msra.mxu3 %v64_v1  ;;  %v66_v11 = vld [vmem:[%s3040_s1 + $0x10] sm:$0xff]  ;;  %v67_v12 = vld [vmem:[%s3040_s1 + $0x18] sm:$0xff]  ;;  %v2083_v13 = vld [vmem:[#allocation3 + $0x1e8] sm:$0xff] }
  0x11   :  { %1642 = vmatmul.msk.f32.vlgmr.msra.gmra.mxu0 %vm82_vm0, %v56_v2  ;;  %1647 = vmatmul.msk.f32.vlgmr.msra.gmra.mxu1 %vm82_vm0, %v2044_v3  ;;  %v2086_v14 = vld [vmem:[#allocation3 + $0x1c0] sm:$0xff]  ;;  %v2088_v15 = vld [vmem:[#allocation3 + $0x1f8] sm:$0xff]  ;;  %v2090_v16 = vld [vmem:[#allocation3 + $0x1c8] sm:$0xff] }
  0x12   :  { %1648 = vmatmul.msk.f32.vlgmr.msra.gmra.mxu2 %vm82_vm0, %v2049_v4  ;;  %1649 = vmatmul.msk.f32.vlgmr.msra.gmra.mxu3 %vm82_vm0, %v2054_v5  ;;  %v2092_v17 = vld [vmem:[#allocation3 + $0x1f0] sm:$0xff]  ;;  %v57_v18 = vld [vmem:[%s3039_s0 + $0x8] sm:$0xff]  ;;  %v2101_v19 = vld [vmem:[#allocation3 + $0x1a0] sm:$0xff] }
  0x13   :  { %162 = vmatpush.msrb.mxu1 %v69_v6  ;;  %203 = vmatpush.msrb.mxu2 %v70_v7  ;;  %v2103_v20 = vld [vmem:[#allocation3 + $0x1a8] sm:$0xff]  ;;  %v2108_v21 = vld [vmem:[#allocation3 + $0x1d8] sm:$0xff]  ;;  %v2110_v22 = vld [vmem:[#allocation3 + $0x1d0] sm:$0xff] }
  0x14   :  { %244 = vmatpush.msrb.mxu3 %v71_v8  ;;  %371 = vmatpush.msrb.mxu0 %v2068_v9  ;;  %v2114_v23 = vld [vmem:[#allocation3 + $0x180] sm:$0xff]  ;;  %v2116_v24 = vld [vmem:[#allocation3 + $0x188] sm:$0xff]  ;;  %v2120_v25 = vld [vmem:[#allocation3 + $0x1b8] sm:$0xff] }
  0x15   :  { %163 = vmatpush.msrb.mxu1 %v65_v10  ;;  %204 = vmatpush.msrb.mxu2 %v66_v11  ;;  %v2122_v26 = vld [vmem:[#allocation3 + $0x1b0] sm:$0xff]  ;;  %v2124_v27 = vld [vmem:[#allocation3 + $0x160] sm:$0xff]  ;;  %v2127_v28 = vld [vmem:[#allocation3 + $0x168] sm:$0xff] }
  0x16   :  { %245 = vmatpush.msrb.mxu3 %v67_v12  ;;  %372 = vmatpush.msrb.mxu0 %v2086_v14  ;;  %v2132_v29 = vld [vmem:[#allocation3 + $0x198] sm:$0xff]  ;;  %v2134_v30 = vld [vmem:[#allocation3 + $0x190] sm:$0xff]  ;;  %v2143_v32 = vld [vmem:[#allocation3 + $0x140] sm:$0xff] }
  0x17   :  { %391 = vmatpush.msra.mxu1 %v2083_v13  ;;  %411 = vmatpush.msra.mxu2 %v2092_v17  ;;  %v58_v31 = vld [vmem:[%s3039_s0 + $0x10] sm:$0xff]  ;;  %v2146_v33 = vld [vmem:[#allocation3 + $0x148] sm:$0xff]  ;;  %v2151_v34 = vld [vmem:[#allocation3 + $0x178] sm:$0xff] }
  0x18   :  { %431 = vmatpush.msra.mxu3 %v2088_v15  ;;  %373 = vmatpush.msrb.mxu0 %v2101_v19  ;;  %v2153_v35 = vld [vmem:[#allocation3 + $0x170] sm:$0xff]  ;;  %v2157_v36 = vld [vmem:[#allocation3 + $0x120] sm:$0xff]  ;;  %v2159_v37 = vld [vmem:[#allocation3 + $0x128] sm:$0xff] }
  0x19   :  { %392 = vmatpush.msra.mxu1 %v2090_v16  ;;  %1643 = vmatmul.msk.f32.gmra.mxu0 %vm82_vm0, %v57_v18  ;;  %v2163_v38 = vld [vmem:[#allocation3 + $0x158] sm:$0xff]  ;;  %v2165_v39 = vld [vmem:[#allocation3 + $0x150] sm:$0xff]  ;;  %v2167_v40 = vld [vmem:[#allocation3 + $0x100] sm:$0xff] }
  0x1a   :  { %1650 = vmatmul.msk.f32.vlgmr.msrb.gmra.mxu1 %vm82_vm0, %v56_v2  ;;  %1658 = vmatmul.msk.f32.vlgmr.msrb.gmra.mxu2 %vm82_vm0, %v56_v2  ;;  %v2170_v41 = vld [vmem:[#allocation3 + $0x108] sm:$0xff]  ;;  %v2175_v42 = vld [vmem:[#allocation3 + $0x138] sm:$0xff]  ;;  %v2177_v43 = vld [vmem:[#allocation3 + $0x130] sm:$0xff] }
  0x1b   :  { %1666 = vmatmul.msk.f32.vlgmr.msrb.gmra.mxu3 %vm82_vm0, %v56_v2  ;;  %393 = vmatpush.msra.mxu1 %v2103_v20  ;;  %v59_v44 = vld [vmem:[%s3039_s0 + $0x18] sm:$0xff]  ;;  %v2186_v45 = vld [vmem:[#allocation3 + $0xe0] sm:$0xff]  ;;  %v2189_v46 = vld [vmem:[#allocation3 + $0xe8] sm:$0xff] }
  0x1c   :  { %432 = vmatpush.msra.mxu3 %v2108_v21  ;;  %412 = vmatpush.msra.mxu2 %v2110_v22  ;;  %v2194_v47 = vld [vmem:[#allocation3 + $0x118] sm:$0xff]  ;;  %v2196_v48 = vld [vmem:[#allocation3 + $0x110] sm:$0xff]  ;;  %v2200_v49 = vld [vmem:[#allocation3 + $0xc0] sm:$0xff] }
  0x1d   :  { %374 = vmatpush.msrb.mxu0 %v2114_v23  ;;  %394 = vmatpush.msra.mxu1 %v2116_v24  ;;  %v2202_v50 = vld [vmem:[#allocation3 + $0xc8] sm:$0xff]  ;;  %v2206_v51 = vld [vmem:[#allocation3 + $0xf8] sm:$0xff]  ;;  %v2208_v52 = vld [vmem:[#allocation3 + $0xf0] sm:$0xff] }
  0x1e   :  { %433 = vmatpush.msra.mxu3 %v2120_v25  ;;  %413 = vmatpush.msra.mxu2 %v2122_v26  ;;  %v2210_v53 = vld [vmem:[#allocation3 + $0xa0] sm:$0xff]  ;;  %v2213_v54 = vld [vmem:[#allocation3 + $0xa8] sm:$0xff]  ;;  %v2218_v55 = vld [vmem:[#allocation3 + $0xd8] sm:$0xff] }
  0x1f   :  { %375 = vmatpush.msrb.mxu0 %v2124_v27  ;;  %395 = vmatpush.msra.mxu1 %v2127_v28  ;;  %3141 = vst [vmem:[#allocation12_spill] sm:$0xff] %v2210_v53  ;;  %v2220_v56 = vld [vmem:[#allocation3 + $0xd0] sm:$0xff]  ;;  %v2222_v57 = vld [vmem:[#allocation3 + $0x80] sm:$0xff]  ;;  %v2237_v60 = vld [vmem:[#allocation3 + $0x88] sm:$0xff] }
  0x20   :  { %434 = vmatpush.msra.mxu3 %v2132_v29  ;;  %414 = vmatpush.msra.mxu2 %v2134_v30  ;;  %3142 = vst [vmem:[#allocation13_spill] sm:$0xff] %v2213_v54  ;;  %v60_v58 = vld [vmem:[%s3039_s0 + $0x20] sm:$0xff]  ;;  %v2239_v61 = vld [vmem:[#allocation3 + $0xb8] sm:$0xff]  ;;  %v2245_v63 = vld [vmem:[#allocation3 + $0xb0] sm:$0xff] }
  0x21   :  { %1644 = vmatmul.msk.f32.gmra.mxu0 %vm82_vm0, %v58_v31  ;;  %396 = vmatpush.msra.mxu1 %v2146_v33  ;;  %3143 = vst [vmem:[#allocation14_spill] sm:$0xff] %v2218_v55  ;;  %v2231_v59 = vld [vmem:[#allocation3 + $0x60] sm:$0xff]  ;;  %v2249_v0 = vld [vmem:[#allocation3 + $0x68] sm:$0xff]  ;;  %v2251_v1 = vld [vmem:[#allocation3 + $0x98] sm:$0xff] }
  0x22   :  { %1651 = vmatmul.msk.f32.gmra.mxu1 %vm82_vm0, %v57_v18  ;;  %1659 = vmatmul.msk.f32.gmra.mxu2 %vm82_vm0, %v57_v18  ;;  %3144 = vst [vmem:[#allocation15_spill] sm:$0xff] %v2222_v57  ;;  %v2243_v62 = vld [vmem:[#allocation3 + $0x40] sm:$0xff]  ;;  %v2257_v6 = vld [vmem:[#allocation3 + $0x90] sm:$0xff]  ;;  %v2260_v7 = vld [vmem:[#allocation3 + $0x48] sm:$0xff] }
  0x23   :  { %1667 = vmatmul.msk.f32.gmra.mxu3 %vm82_vm0, %v57_v18  ;;  %376 = vmatpush.msrb.mxu0 %v2143_v32  ;;  %3145 = vst [vmem:[#allocation16_spill] sm:$0xff] %v2231_v59  ;;  %v2253_v2 = vld [vmem:[#allocation3 + $0x20] sm:$0xff]  ;;  %v2263_v8 = vld [vmem:[#allocation3 + $0x78] sm:$0xff]  ;;  %v2273_v11 = vld [vmem:[#allocation3 + $0x28] sm:$0xff] }
  0x24   :  { %435 = vmatpush.msra.mxu3 %v2151_v34  ;;  %415 = vmatpush.msra.mxu2 %v2153_v35  ;;  %3146 = vst [vmem:[#allocation17_spill] sm:$0xff] %v2237_v60  ;;  %v2265_v10 = vld [vmem:[#allocation3] sm:$0xff]  ;;  %v2277_v12 = vld [vmem:[#allocation3 + $0x70] sm:$0xff]  ;;  %v2279_v18 = vld [vmem:[#allocation3 + $0x58] sm:$0xff] }
  0x25   :  { %377 = vmatpush.msrb.mxu0 %v2157_v36  ;;  %397 = vmatpush.msra.mxu1 %v2159_v37  ;;  %3147 = vst [vmem:[#allocation18_spill] sm:$0xff] %v2239_v61 }
  0x26   :  { %436 = vmatpush.msra.mxu3 %v2163_v38  ;;  %416 = vmatpush.msra.mxu2 %v2165_v39  ;;  %3148 = vst [vmem:[#allocation19_spill] sm:$0xff] %v2243_v62 }
  0x27   :  { %378 = vmatpush.msrb.mxu0 %v2167_v40  ;;  %398 = vmatpush.msra.mxu1 %v2170_v41  ;;  %3149 = vst [vmem:[#allocation20_spill] sm:$0xff] %v2245_v63 }
  0x28   :  { %437 = vmatpush.msra.mxu3 %v2175_v42  ;;  %417 = vmatpush.msra.mxu2 %v2177_v43  ;;  %3150 = vst [vmem:[#allocation21_spill] sm:$0xff] %v2249_v0 }
  0x29   :  { %1645 = vmatmul.msk.f32.gmra.mxu0 %vm82_vm0, %v59_v44  ;;  %399 = vmatpush.msra.mxu1 %v2189_v46  ;;  %3151 = vst [vmem:[#allocation22_spill] sm:$0xff] %v2251_v1 }
  0x2a   :  { %1652 = vmatmul.msk.f32.gmra.mxu1 %vm82_vm0, %v58_v31  ;;  %1660 = vmatmul.msk.f32.gmra.mxu2 %vm82_vm0, %v58_v31  ;;  %3152 = vst [vmem:[#allocation23_spill] sm:$0xff] %v2253_v2 }
  0x2b   :  { %1668 = vmatmul.msk.f32.gmra.mxu3 %vm82_vm0, %v58_v31  ;;  %379 = vmatpush.msrb.mxu0 %v2186_v45  ;;  %3153 = vst [vmem:[#allocation24_spill] sm:$0xff] %v2257_v6  ;;  %v1989_v31 = vmov 0.0  }
  0x2c   :  { %438 = vmatpush.msra.mxu3 %v2194_v47  ;;  %418 = vmatpush.msra.mxu2 %v2196_v48  ;;  %3154 = vst [vmem:[#allocation25_spill] sm:$0xff] %v2260_v7 }
  0x2d   :  { %380 = vmatpush.msrb.mxu0 %v2200_v49  ;;  %400 = vmatpush.msra.mxu1 %v2202_v50  ;;  %3155 = vst [vmem:[#allocation26_spill] sm:$0xff] %v2263_v8 }
  0x2e   :  { %439 = vmatpush.msra.mxu3 %v2206_v51  ;;  %419 = vmatpush.msra.mxu2 %v2208_v52  ;;  %3156 = vst [vmem:[#allocation27_spill] sm:$0xff] %v2265_v10 }
  0x2f   :  { %381 = vmatpush.msrb.mxu0 %v2210_v53  ;;  %401 = vmatpush.msra.mxu1 %v2213_v54  ;;  %3157 = vst [vmem:[#allocation28_spill] sm:$0xff] %v2273_v11 }
  0x30   :  { %440 = vmatpush.msra.mxu3 %v2218_v55  ;;  %420 = vmatpush.msra.mxu2 %v2220_v56  ;;  %3158 = vst [vmem:[#allocation29_spill] sm:$0xff] %v2277_v12 }
  0x31   :  { %382 = vmatpush.msrb.mxu0 %v2222_v57  ;;  %402 = vmatpush.msra.mxu1 %v2237_v60  ;;  %3159 = vst [vmem:[#allocation30_spill] sm:$0xff] %v2279_v18 }
  0x32   :  { %1653 = vmatmul.msk.f32.gmra.mxu1 %vm82_vm0, %v59_v44  ;;  %1646 = vmatmul.msk.f32.gmra.mxu0 %vm82_vm0, %v60_v58 }
  0x33   :  { %1661 = vmatmul.msk.f32.gmra.mxu2 %vm82_vm0, %v59_v44  ;;  %1669 = vmatmul.msk.f32.gmra.mxu3 %vm82_vm0, %v59_v44  ;;  %v2283_v44 = vld [vmem:[#allocation3 + $0x8] sm:$0xff] }
  0x34   :  { %383 = vmatpush.msrb.mxu0 %v2231_v59  ;;  %441 = vmatpush.msra.mxu3 %v2239_v61  ;;  %3160 = vst [vmem:[#allocation31_spill] sm:$0xff] %v2283_v44 }
  0x35   :  { %421 = vmatpush.msra.mxu2 %v2245_v63  ;;  %403 = vmatpush.msra.mxu1 %v2249_v0 }
  0x36   :  { %384 = vmatpush.msrb.mxu0 %v2243_v62  ;;  %442 = vmatpush.msra.mxu3 %v2251_v1 }
  0x37   :  { %422 = vmatpush.msra.mxu2 %v2257_v6  ;;  %404 = vmatpush.msra.mxu1 %v2260_v7  ;;  %v2294_v7 = vld [vmem:[#allocation3 + $0x30] sm:$0xff] }
  0x38   :  { %385 = vmatpush.msrb.mxu0 %v2253_v2  ;;  %443 = vmatpush.msra.mxu3 %v2263_v8  ;;  %v2287_v2 = vld [vmem:[#allocation3 + $0x50] sm:$0xff]  ;;  %3163 = vst [vmem:[#allocation34_spill] sm:$0xff] %v2294_v7  ;;  %v2296_v8 = vld [vmem:[#allocation3 + $0x18] sm:$0xff] }
  0x39   :  { %405 = vmatpush.msra.mxu1 %v2273_v11  ;;  %3161 = vst [vmem:[#allocation32_spill] sm:$0xff] %v2287_v2  ;;  %423 = vmatpush.msra.mxu2 %v2277_v12 }
  0x3a   :  { %386 = vmatpush.msrb.mxu0 %v2265_v10  ;;  %1654 = vmatmul.msk.f32.gmra.mxu1 %vm82_vm0, %v60_v58  ;;  %v2289_v10 = vld [vmem:[#allocation3 + $0x38] sm:$0xff]  ;;  %3164 = vst [vmem:[#allocation35_spill] sm:$0xff] %v2296_v8 }
  0x3b   :  { %1662 = vmatmul.msk.f32.gmra.mxu2 %vm82_vm0, %v60_v58  ;;  %387 = vmatmul.f32.vlgmr.msrb.gmra.mxu0 %v1989_v31  ;;  %3162 = vst [vmem:[#allocation33_spill] sm:$0xff] %v2289_v10 }
  0x3c   :  { %1670 = vmatmul.msk.f32.gmra.mxu3 %vm82_vm0, %v60_v58  ;;  %406 = vmatpush.msra.mxu1 %v2283_v44  ;;  %v2304_v58 = vld [vmem:[#allocation3 + $0x10] sm:$0xff] }
  0x3d   :  { %444 = vmatpush.msra.mxu3 %v2279_v18  ;;  %523 = vmatpush.msra.mxu0 %v2068_v9  ;;  %3165 = vst [vmem:[#allocation36_spill] sm:$0xff] %v2304_v58 }
  0x3e   :  { %424 = vmatpush.msra.mxu2 %v2287_v2  ;;  %543 = vmatpush.msrb.mxu1 %v2083_v13 }
  0x3f   :  { %445 = vmatpush.msra.mxu3 %v2289_v10  ;;  %524 = vmatpush.msra.mxu0 %v2086_v14 }
  0x40   :  { %425 = vmatpush.msra.mxu2 %v2294_v7  ;;  %544 = vmatpush.msrb.mxu1 %v2090_v16 }
  0x41   :  { %446 = vmatpush.msra.mxu3 %v2296_v8  ;;  %525 = vmatpush.msra.mxu0 %v2101_v19 }
  0x42   :  { %1655 = vmatmul.msk.f32.gmra.mxu1 %vm82_vm0, %v2044_v3  ;;  %426 = vmatpush.msra.mxu2 %v2304_v58 }
  0x43   :  { %583 = vmatpush.msrb.mxu3 %v2088_v15  ;;  %1663 = vmatmul.msk.f32.gmra.mxu2 %vm82_vm0, %v2044_v3 }
  0x44   :  { %1671 = vmatmul.msk.f32.gmra.mxu3 %vm82_vm0, %v2044_v3  ;;  %563 = vmatpush.msrb.mxu2 %v2092_v17  ;;  %v3166_v3 = vld [vmem:[#allocation26_spill] sm:$0xff] }
  0x45   :  { %584 = vmatpush.msrb.mxu3 %v2108_v21  ;;  %545 = vmatpush.msrb.mxu1 %v2103_v20 }
  0x46   :  { %564 = vmatpush.msrb.mxu2 %v2110_v22  ;;  %526 = vmatpush.msra.mxu0 %v2114_v23 }
  0x47   :  { %585 = vmatpush.msrb.mxu3 %v2120_v25  ;;  %546 = vmatpush.msrb.mxu1 %v2116_v24 }
  0x48   :  { %565 = vmatpush.msrb.mxu2 %v2122_v26  ;;  %527 = vmatpush.msra.mxu0 %v2124_v27 }
  0x49   :  { %586 = vmatpush.msrb.mxu3 %v2132_v29  ;;  %547 = vmatpush.msrb.mxu1 %v2127_v28 }
  0x4a   :  { %1656 = vmatmul.msk.f32.gmra.mxu1 %vm82_vm0, %v2049_v4  ;;  %566 = vmatpush.msrb.mxu2 %v2134_v30 }
  0x4b   :  { %1664 = vmatmul.msk.f32.gmra.mxu2 %vm82_vm0, %v2049_v4  ;;  %587 = vmatpush.msrb.mxu3 %v2151_v34 }
  0x4c   :  { %1672 = vmatmul.msk.f32.gmra.mxu3 %vm82_vm0, %v2049_v4  ;;  %528 = vmatpush.msra.mxu0 %v2143_v32  ;;  %v3167_v4 = vld [vmem:[#allocation25_spill] sm:$0xff] }
  0x4d   :  { %567 = vmatpush.msrb.mxu2 %v2153_v35  ;;  %548 = vmatpush.msrb.mxu1 %v2146_v33 }
  0x4e   :  { %588 = vmatpush.msrb.mxu3 %v2163_v38  ;;  %529 = vmatpush.msra.mxu0 %v2157_v36 }
  0x4f   :  { %568 = vmatpush.msrb.mxu2 %v2165_v39  ;;  %549 = vmatpush.msrb.mxu1 %v2159_v37 }
  0x50   :  { %589 = vmatpush.msrb.mxu3 %v2175_v42  ;;  %530 = vmatpush.msra.mxu0 %v2167_v40 }
  0x51   :  { %569 = vmatpush.msrb.mxu2 %v2177_v43  ;;  %550 = vmatpush.msrb.mxu1 %v2170_v41 }
  0x52   :  { %1657 = vmatmul.msk.f32.gmra.mxu1 %vm82_vm0, %v2054_v5  ;;  %590 = vmatpush.msrb.mxu3 %v2194_v47 }
  0x53   :  { %1665 = vmatmul.msk.f32.gmra.mxu2 %vm82_vm0, %v2054_v5  ;;  %531 = vmatpush.msra.mxu0 %v2186_v45 }
  0x54   :  { %1673 = vmatmul.msk.f32.gmra.mxu3 %vm82_vm0, %v2054_v5  ;;  %570 = vmatpush.msrb.mxu2 %v2196_v48  ;;  %v3168_v5 = vld [vmem:[#allocation23_spill] sm:$0xff] }
  0x55   :  { %551 = vmatpush.msrb.mxu1 %v2189_v46  ;;  %591 = vmatpush.msrb.mxu3 %v2206_v51 }
  0x56   :  { %571 = vmatpush.msrb.mxu2 %v2208_v52  ;;  %532 = vmatpush.msra.mxu0 %v2200_v49 }
  0x57   :  { %552 = vmatpush.msrb.mxu1 %v2202_v50  ;;  %592 = vmatpush.msrb.mxu3 %v2218_v55 }
  0x58   :  { %572 = vmatpush.msrb.mxu2 %v2220_v56  ;;  %533 = vmatpush.msra.mxu0 %v2210_v53 }
  0x59   :  { %553 = vmatpush.msrb.mxu1 %v2213_v54  ;;  %593 = vmatpush.msrb.mxu3 %v2239_v61 }
  0x5a   :  { %407 = vmatmul.f32.vlgmr.msra.gmra.mxu1 %v1989_v31  ;;  %573 = vmatpush.msrb.mxu2 %v2245_v63 }
  0x5b   :  { %427 = vmatmul.f32.vlgmr.msra.gmra.mxu2 %v1989_v31  ;;  %534 = vmatpush.msra.mxu0 %v2222_v57 }
  0x5c   :  { %447 = vmatmul.f32.vlgmr.msra.gmra.mxu3 %v1989_v31  ;;  %554 = vmatpush.msrb.mxu1 %v2237_v60  ;;  %v3169_v31 = vld [vmem:[#allocation27_spill] sm:$0xff] }
  0x5d   :  { %574 = vmatpush.msrb.mxu2 %v2257_v6  ;;  %535 = vmatpush.msra.mxu0 %v2231_v59 }
  0x5e   :  { %594 = vmatpush.msrb.mxu3 %v2251_v1  ;;  %555 = vmatpush.msrb.mxu1 %v2249_v0 }
  0x5f   :  { %575 = vmatpush.msrb.mxu2 %v2277_v12  ;;  %536 = vmatpush.msra.mxu0 %v2243_v62 }
  0x60   :  { %595 = vmatpush.msrb.mxu3 %v3166_v3  ;;  %556 = vmatpush.msrb.mxu1 %v3167_v4 }
  0x61   :  { %576 = vmatpush.msrb.mxu2 %v2287_v2  ;;  %537 = vmatpush.msra.mxu0 %v3168_v5 }
  0x62   :  { %596 = vmatpush.msrb.mxu3 %v2279_v18  ;;  %557 = vmatpush.msrb.mxu1 %v2273_v11 }
  0x63   :  { %577 = vmatpush.msrb.mxu2 %v2294_v7  ;;  %538 = vmatpush.msra.mxu0 %v3169_v31 }
  0x64   :  { %597 = vmatpush.msrb.mxu3 %v2289_v10  ;;  %558 = vmatpush.msrb.mxu1 %v2283_v44 }
  0x65   :  { %578 = vmatpush.msrb.mxu2 %v2304_v58  ;;  %675 = vmatpush.msrb.mxu0 %v2068_v9 }
  0x66   :  { %598 = vmatpush.msrb.mxu3 %v2296_v8  ;;  %695 = vmatpush.msra.mxu1 %v2083_v13 }
  0x67   :  { %715 = vmatpush.msra.mxu2 %v2092_v17  ;;  %676 = vmatpush.msrb.mxu0 %v2086_v14 }
  0x68   :  { %735 = vmatpush.msra.mxu3 %v2088_v15  ;;  %696 = vmatpush.msra.mxu1 %v2090_v16 }
  0x69   :  { %716 = vmatpush.msra.mxu2 %v2110_v22  ;;  %677 = vmatpush.msrb.mxu0 %v2101_v19 }
  0x6a   :  { %736 = vmatpush.msra.mxu3 %v2108_v21  ;;  %697 = vmatpush.msra.mxu1 %v2103_v20 }
  0x6b   :  { %717 = vmatpush.msra.mxu2 %v2122_v26  ;;  %678 = vmatpush.msrb.mxu0 %v2114_v23 }
  0x6c   :  { %737 = vmatpush.msra.mxu3 %v2120_v25  ;;  %698 = vmatpush.msra.mxu1 %v2116_v24 }
  0x6d   :  { %718 = vmatpush.msra.mxu2 %v2134_v30  ;;  %679 = vmatpush.msrb.mxu0 %v2124_v27 }
  0x6e   :  { %738 = vmatpush.msra.mxu3 %v2132_v29  ;;  %699 = vmatpush.msra.mxu1 %v2127_v28 }
  0x6f   :  { %719 = vmatpush.msra.mxu2 %v2153_v35  ;;  %680 = vmatpush.msrb.mxu0 %v2143_v32 }
  0x70   :  { %739 = vmatpush.msra.mxu3 %v2151_v34  ;;  %700 = vmatpush.msra.mxu1 %v2146_v33 }
  0x71   :  { %720 = vmatpush.msra.mxu2 %v2165_v39  ;;  %681 = vmatpush.msrb.mxu0 %v2157_v36 }
  0x72   :  { %740 = vmatpush.msra.mxu3 %v2163_v38  ;;  %701 = vmatpush.msra.mxu1 %v2159_v37 }
  0x73   :  { %721 = vmatpush.msra.mxu2 %v2177_v43  ;;  %682 = vmatpush.msrb.mxu0 %v2167_v40 }
  0x74   :  { %741 = vmatpush.msra.mxu3 %v2175_v42  ;;  %702 = vmatpush.msra.mxu1 %v2170_v41 }
  0x75   :  { %722 = vmatpush.msra.mxu2 %v2196_v48  ;;  %683 = vmatpush.msrb.mxu0 %v2186_v45 }
  0x76   :  { %742 = vmatpush.msra.mxu3 %v2194_v47  ;;  %703 = vmatpush.msra.mxu1 %v2189_v46 }
  0x77   :  { %723 = vmatpush.msra.mxu2 %v2208_v52  ;;  %684 = vmatpush.msrb.mxu0 %v2200_v49 }
  0x78   :  { %743 = vmatpush.msra.mxu3 %v2206_v51  ;;  %704 = vmatpush.msra.mxu1 %v2202_v50 }
  0x79   :  { %724 = vmatpush.msra.mxu2 %v2220_v56  ;;  %685 = vmatpush.msrb.mxu0 %v2210_v53 }
  0x7a   :  { %744 = vmatpush.msra.mxu3 %v2218_v55  ;;  %705 = vmatpush.msra.mxu1 %v2213_v54 }
  0x7b   :  { %725 = vmatpush.msra.mxu2 %v2245_v63  ;;  %686 = vmatpush.msrb.mxu0 %v2222_v57 }
  0x7c   :  { %745 = vmatpush.msra.mxu3 %v2239_v61  ;;  %706 = vmatpush.msra.mxu1 %v2237_v60 }
  0x7d   :  { %726 = vmatpush.msra.mxu2 %v2257_v6  ;;  %687 = vmatpush.msrb.mxu0 %v2231_v59 }
  0x7e   :  { %746 = vmatpush.msra.mxu3 %v2251_v1  ;;  %707 = vmatpush.msra.mxu1 %v2249_v0 }
  0x7f   :  { %727 = vmatpush.msra.mxu2 %v2277_v12  ;;  %688 = vmatpush.msrb.mxu0 %v2243_v62 }
  0x80   :  { %747 = vmatpush.msra.mxu3 %v3166_v3  ;;  %708 = vmatpush.msra.mxu1 %v3167_v4 }
  0x81   :  { %728 = vmatpush.msra.mxu2 %v2287_v2  ;;  %689 = vmatpush.msrb.mxu0 %v3168_v5 }
  0x82   :  { %748 = vmatpush.msra.mxu3 %v2279_v18  ;;  %709 = vmatpush.msra.mxu1 %v2273_v11  ;;  %v72_v18 = vld [vmem:[%s3042_s3] sm:$0xf] }
  0x83   :  { %729 = vmatpush.msra.mxu2 %v2294_v7  ;;  %690 = vmatpush.msrb.mxu0 %v3169_v31  ;;  %v74_v2 = vperm.slane %v72_v18, 0 }
  0x84   :  { %749 = vmatpush.msra.mxu3 %v2289_v10  ;;  %710 = vmatpush.msra.mxu1 %v2283_v44 }
  0x85   :  { %730 = vmatpush.msra.mxu2 %v2304_v58 }
  0x86   :  { %750 = vmatpush.msra.mxu3 %v2296_v8  ;;  %v75_v8 = vperm.slane %v72_v18, 1 }
  0x8e   :  { %v124_v5 = vpop.f32.mrf.mxu0  ;;  %v139_v4 = vpop.f32.mrf.mxu1 }
  0x8f   :  { %v2457_v11 = vadd.f32 %v139_v4, %v74_v2 }
  0x91   :  { %3170 = vst [vmem:[#allocation37_spill] sm:$0xff] %v2457_v11  ;;  %v2473_v11 = vperm.slane %v72_v18, 2 }
  0x95   :  { %v142_v7 = vpop.f32.mrf.mxu2  ;;  %v145_v62 = vpop.f32.mrf.mxu3 }
  0x96   :  { %v2459_v10 = vadd.f32 %v142_v7, %v74_v2  ;;  %v2461_v31 = vadd.f32 %v145_v62, %v74_v2  ;;  %v127_v44 = vpop.f32.mrf.mxu0  ;;  %v77_v7 = vperm.slane %v72_v18, 3 }
  0x97   :  { %v165_v3 = vpop.f32.mrf.mxu1  ;;  %v2463_v58 = vadd.f32 %v127_v44, %v74_v2 }
  0x98   :  { %3171 = vst [vmem:[#allocation38_spill] sm:$0xff] %v2459_v10 }
  0x99   :  { %3172 = vst [vmem:[#allocation39_spill] sm:$0xff] %v2461_v31 }
  0x9a   :  { %3173 = vst [vmem:[#allocation40_spill] sm:$0xff] %v2463_v58 }
  0x9d   :  { %v2465_v12 = vpop.f32.mrf.mxu2 }
  0x9e   :  { %v2467_v0 = vpop.f32.mrf.mxu3  ;;  %v130_v59 = vpop.f32.mrf.mxu0 }
  0x9f   :  { %v168_v1 = vpop.f32.mrf.mxu1  ;;  %v2469_v6 = vadd.f32 %v130_v59, %v74_v2 }
  0xa0   :  { %v2471_v4 = vadd.f32 %v168_v1, %v75_v8 }
  0xa1   :  { %3174 = vst [vmem:[#allocation41_spill] sm:$0xff] %v2469_v6 }
  0xa2   :  { %3175 = vst [vmem:[#allocation42_spill] sm:$0xff] %v2471_v4 }
  0xa5   :  { %v209_v62 = vpop.f32.mrf.mxu2 }
  0xa6   :  { %v250_v31 = vpop.f32.mrf.mxu3  ;;  %v2476_v10 = vadd.f32 %v209_v62, %v2473_v11  ;;  %v133_v58 = vpop.f32.mrf.mxu0 }
  0xa7   :  { %v2478_v44 = vadd.f32 %v250_v31, %v77_v7  ;;  %v171_v60 = vpop.f32.mrf.mxu1  ;;  %v2480_v57 = vadd.f32 %v133_v58, %v74_v2 }
  0xa8   :  { %3176 = vst [vmem:[#allocation43_spill] sm:$0xff] %v2476_v10  ;;  %v2482_v61 = vadd.f32 %v171_v60, %v75_v8 }
  0xa9   :  { %3177 = vst [vmem:[#allocation44_spill] sm:$0xff] %v2478_v44 }
  0xaa   :  { %3178 = vst [vmem:[#allocation45_spill] sm:$0xff] %v2480_v57 }
  0xab   :  { %3179 = vst [vmem:[#allocation46_spill] sm:$0xff] %v2482_v61 }
  0xad   :  { %v212_v59 = vpop.f32.mrf.mxu2 }
  0xae   :  { %v253_v6 = vpop.f32.mrf.mxu3  ;;  %v2485_v1 = vadd.f32 %v212_v59, %v2473_v11 }
  0xaf   :  { %v2487_v4 = vadd.f32 %v253_v6, %v77_v7  ;;  %v174_v18 = vpop.f32.mrf.mxu1  ;;  %v136_v63 = vpop.f32.mrf.mxu0 }
  0xb0   :  { %3180 = vst [vmem:[#allocation47_spill] sm:$0xff] %v2485_v1  ;;  %v2489_v54 = vadd.f32 %v174_v18, %v75_v8  ;;  %v2491_v62 = vadd.f32 %v136_v63, %v74_v2 }
  0xb1   :  { %3181 = vst [vmem:[#allocation48_spill] sm:$0xff] %v2487_v4 }
  0xb2   :  { %3182 = vst [vmem:[#allocation49_spill] sm:$0xff] %v2489_v54  ;;  %v125_v54 = vadd.f32 %v124_v5, %v74_v2 }
  0xb3   :  { %3183 = vst [vmem:[#allocation50_spill] sm:$0xff] %v2491_v62 }
  0xb6   :  { %v215_v31 = vpop.f32.mrf.mxu2  ;;  %v256_v58 = vpop.f32.mrf.mxu3 }
  0xb7   :  { %v2494_v10 = vadd.f32 %v215_v31, %v2473_v11  ;;  %v177_v60 = vpop.f32.mrf.mxu1  ;;  %v2496_v57 = vadd.f32 %v256_v58, %v77_v7 }
  0xb8   :  { %v2498_v61 = vadd.f32 %v177_v60, %v75_v8  ;;  %v388_v62 = vpop.f32.mrf.mxu0 }
  0xb9   :  { %3184 = vst [vmem:[#allocation51_spill] sm:$0xff] %v2494_v10  ;;  %v451_v31 = vadd.f32 %v388_v62, %v125_v54  ;;  %v166_v62 = vadd.f32 %v165_v3, %v75_v8 }
  0xba   :  { %3185 = vst [vmem:[#allocation52_spill] sm:$0xff] %v2496_v57 }
  0xbb   :  { %3186 = vst [vmem:[#allocation53_spill] sm:$0xff] %v2498_v61  ;;  %v1674_v61 = vmul.f32 -1.442695, %v451_v31 }
  0xbd   :  { %1713 = vpow2.f32 %v1674_v61 }
  0xbe   :  { %v218_v59 = vpop.f32.mrf.mxu2 }
  0xbf   :  { %v2501_v6 = vadd.f32 %v218_v59, %v2473_v11  ;;  %v259_v1 = vpop.f32.mrf.mxu3  ;;  %v180_v4 = vpop.f32.mrf.mxu1 }
  0xc0   :  { %v2503_v18 = vadd.f32 %v259_v1, %v77_v7  ;;  %v2505_v63 = vadd.f32 %v180_v4, %v75_v8 }
  0xc1   :  { %3187 = vst [vmem:[#allocation54_spill] sm:$0xff] %v2501_v6 }
  0xc2   :  { %3188 = vst [vmem:[#allocation55_spill] sm:$0xff] %v2503_v18 }
  0xc3   :  { %3189 = vst [vmem:[#allocation56_spill] sm:$0xff] %v2505_v63 }
  0xc6   :  { %v221_v10 = vpop.f32.mrf.mxu2 }
  0xc7   :  { %v2508_v44 = vadd.f32 %v221_v10, %v2473_v11  ;;  %v262_v58 = vpop.f32.mrf.mxu3  ;;  %v183_v60 = vpop.f32.mrf.mxu1 }
  0xc8   :  { %v2510_v57 = vadd.f32 %v262_v58, %v77_v7  ;;  %v2512_v59 = vadd.f32 %v183_v60, %v75_v8  ;;  %v1714_v10 = vpop.eup %1713 }
  0xc9   :  { %3190 = vst [vmem:[#allocation57_spill] sm:$0xff] %v2508_v44  ;;  %v458_v5 = vadd.f32 1.0, %v1714_v10 }
  0xca   :  { %3191 = vst [vmem:[#allocation58_spill] sm:$0xff] %v2510_v57 }
  0xcb   :  { %3192 = vst [vmem:[#allocation59_spill] sm:$0xff] %v2512_v59  ;;  %1715 = vrcp.f32 %v458_v5  ;;  %vm464_vm2 = vweird.f32 %v458_v5 }
  0xce   :  { %v224_v6 = vpop.f32.mrf.mxu2 }
  0xcf   :  { %v2515_v1 = vadd.f32 %v224_v6, %v2473_v11  ;;  %v265_v4 = vpop.f32.mrf.mxu3  ;;  %v186_v63 = vpop.f32.mrf.mxu1 }
  0xd0   :  { %v2517_v2 = vadd.f32 %v265_v4, %v77_v7  ;;  %v2519_v54 = vadd.f32 %v186_v63, %v75_v8  ;;  %v248_v4 = vadd.f32 %v2467_v0, %v77_v7 }
  0xd1   :  { %3193 = vst [vmem:[#allocation60_spill] sm:$0xff] %v2515_v1  ;;  %v1716_v1 = vpop.eup %1715 }
  0xd2   :  { %3194 = vst [vmem:[#allocation61_spill] sm:$0xff] %v2517_v2  ;;  %v460_v10 = vmul.f32 %v1716_v1, %v458_v5  ;;  %vm465_vm1 = vweird.f32 %v1716_v1 }
  0xd3   :  { %3195 = vst [vmem:[#allocation62_spill] sm:$0xff] %v2519_v54  ;;  %vm466_vm4 = vmor %vm464_vm2, %vm465_vm1 }
  0xd6   :  { %v227_v44 = vpop.f32.mrf.mxu2 }
  0xd7   :  { %v2522_v31 = vadd.f32 %v227_v44, %v2473_v11  ;;  %v268_v58 = vpop.f32.mrf.mxu3  ;;  %v408_v60 = vpop.f32.mrf.mxu1 }
  0xd8   :  { %v2524_v61 = vadd.f32 %v268_v58, %v77_v7  ;;  %v452_v59 = vadd.f32 %v408_v60, %v166_v62  ;;  %v207_v58 = vadd.f32 %v2465_v12, %v2473_v11 }
  0xd9   :  { %3196 = vst [vmem:[#allocation63_spill] sm:$0xff] %v2522_v31  ;;  %v461_v31 = vsub.f32 1.0, %v460_v10 }
  0xda   :  { %3197 = vst [vmem:[#allocation64_spill] sm:$0xff] %v2524_v61  ;;  %v1675_v6 = vmul.f32 -1.442695, %v452_v59 }
  0xdb   :  { %v462_v59 = vmul.f32 %v1716_v1, %v461_v31 }
  0xdc   :  { %1717 = vpow2.f32 %v1675_v6 }
  0xde   :  { %v428_v44 = vpop.f32.mrf.mxu2 }
  0xdf   :  { %v448_v63 = vpop.f32.mrf.mxu3  ;;  %v453_v62 = vadd.f32 %v428_v44, %v207_v58 }
  0xe0   :  { %v454_v54 = vadd.f32 %v448_v63, %v248_v4  ;;  %v463_v4 = vadd.f32 %v1716_v1, %v462_v59 }
  0xe2   :  { %v1718_v2 = vpop.eup %1717  ;;  %v1676_v8 = vmul.f32 -1.442695, %v454_v54  ;;  %v467_v12 = vsel %vm466_vm4, %v1716_v1, %v463_v4 }
  0xe3   :  { %v477_v3 = vadd.f32 1.0, %v1718_v2  ;;  %v470_v2 = vand.u32 2147483648, %v458_v5 }
  0xe4   :  { %1719 = vpow2.f32 %v1676_v8  ;;  %v468_v8 = vand.u32 2147483647, %v458_v5 }
  0xe5   :  { %1721 = vrcp.f32 %v477_v3  ;;  %v489_v54 = vand.u32 2147483648, %v477_v3  ;;  %v487_v57 = vand.u32 2147483647, %v477_v3  ;;  %vm483_vm5 = vweird.f32 %v477_v3 }
  0xe6   :  { %1723 = vtanh.f32 %v453_v62  ;;  %v471_v58 = vor.u32 1.1754944e-38, %v470_v2  ;;  %vm469_vm7 = vcmp.eq.f32.partialorder %v468_v8, 8.507059e+37 }
  0xe7   :  { %v490_v44 = vor.u32 1.1754944e-38, %v489_v54  ;;  %vm488_vm8 = vcmp.eq.f32.partialorder %v487_v57, 8.507059e+37 }
  0xe8   :  { %v472_v59 = vsel %vm469_vm7, %v471_v58, %v467_v12 }
  0xea   :  { %v1720_v60 = vpop.eup %1719 }
  0xeb   :  { %v1722_v6 = vpop.eup %1721  ;;  %v497_v61 = vadd.f32 1.0, %v1720_v60 }
  0xec   :  { %v479_v0 = vmul.f32 %v1722_v6, %v477_v3  ;;  %vm484_vm3 = vweird.f32 %v1722_v6  ;;  %v1724_v11 = vpop.eup %1723 }
  0xed   :  { %1725 = vrcp.f32 %v497_v61  ;;  %vm485_vm6 = vmor %vm483_vm5, %vm484_vm3  ;;  %v509_v3 = vand.u32 2147483648, %v497_v61  ;;  %vm503_vm10 = vweird.f32 %v497_v61  ;;  %v507_v4 = vand.u32 2147483647, %v497_v61 }
  0xee   :  { %v480_v7 = vsub.f32 1.0, %v479_v0 }
  0xef   :  { %vm508_vm12 = vcmp.eq.f32.partialorder %v507_v4, 8.507059e+37 }
  0xf0   :  { %v481_v63 = vmul.f32 %v1722_v6, %v480_v7  ;;  %v514_v7 = vmul.f32 %v1724_v11, %v472_v59 }
  0xf2   :  { %v482_v31 = vadd.f32 %v1722_v6, %v481_v63 }
  0xf3   :  { %v1726_v10 = vpop.eup %1725 }
  0xf4   :  { %v486_v62 = vsel %vm485_vm6, %v1722_v6, %v482_v31  ;;  %v499_v60 = vmul.f32 %v1726_v10, %v497_v61  ;;  %vm504_vm9 = vweird.f32 %v1726_v10  ;;  %v510_v6 = vor.u32 1.1754944e-38, %v509_v3  ;;  %v3226_v31 = vld [vmem:[#allocation43_spill] sm:$0xff] }
  0xf5   :  { %v491_v0 = vsel %vm488_vm8, %v490_v44, %v486_v62  ;;  %vm505_vm11 = vmor %vm503_vm10, %vm504_vm9 }
  0xf6   :  { %v513_v18 = vmul.f32 0.0, %v491_v0  ;;  %v500_v5 = vsub.f32 1.0, %v499_v60 }
  0xf8   :  { %v2529_v53 = vadd.f32 %v514_v7, %v513_v18  ;;  %v501_v55 = vmul.f32 %v1726_v10, %v500_v5 }
  0xfa   :  { %1727 = vtanh.f32 %v2529_v53  ;;  %v502_v1 = vadd.f32 %v1726_v10, %v501_v55 }
  0xfc   :  { %v506_v54 = vsel %vm505_vm11, %v1726_v10, %v502_v1 }
  0xfd   :  { %v511_v2 = vsel %vm508_vm12, %v510_v6, %v506_v54 }
 0x100   :  { %v1728_v57 = vpop.eup %1727 }
 0x101   :  { %v517_v63 = vmul.f32 %v1728_v57, %v511_v2 }
 0x103   :  { %539 = vmatmul.f32.vlgmr.msra.gmra.mxu0 %v517_v63  ;;  %559 = vmatmul.f32.vlgmr.msrb.gmra.mxu1 %v517_v63 }
 0x104   :  { %579 = vmatmul.f32.vlgmr.msrb.gmra.mxu2 %v517_v63  ;;  %599 = vmatmul.f32.vlgmr.msrb.gmra.mxu3 %v517_v63 }
 0x105   :  { %827 = vmatpush.msra.mxu0 %v2068_v9  ;;  %847 = vmatpush.msrb.mxu1 %v2083_v13  ;;  %v3198_v9 = vld [vmem:[#allocation14_spill] sm:$0xff]  ;;  %v3199_v13 = vld [vmem:[#allocation12_spill] sm:$0xff] }
 0x106   :  { %867 = vmatpush.msrb.mxu2 %v2092_v17  ;;  %887 = vmatpush.msrb.mxu3 %v2088_v15  ;;  %v3201_v15 = vld [vmem:[#allocation20_spill] sm:$0xff]  ;;  %v3203_v17 = vld [vmem:[#allocation15_spill] sm:$0xff] }
 0x107   :  { %828 = vmatpush.msra.mxu0 %v2086_v14  ;;  %848 = vmatpush.msrb.mxu1 %v2090_v16  ;;  %v3200_v14 = vld [vmem:[#allocation13_spill] sm:$0xff]  ;;  %v3202_v16 = vld [vmem:[#allocation18_spill] sm:$0xff] }
 0x108   :  { %868 = vmatpush.msrb.mxu2 %v2110_v22  ;;  %888 = vmatpush.msrb.mxu3 %v2108_v21  ;;  %v3206_v21 = vld [vmem:[#allocation22_spill] sm:$0xff]  ;;  %v3207_v22 = vld [vmem:[#allocation16_spill] sm:$0xff] }
 0x109   :  { %829 = vmatpush.msra.mxu0 %v2101_v19  ;;  %849 = vmatpush.msrb.mxu1 %v2103_v20  ;;  %v3204_v19 = vld [vmem:[#allocation17_spill] sm:$0xff]  ;;  %v3205_v20 = vld [vmem:[#allocation24_spill] sm:$0xff] }
 0x10a   :  { %869 = vmatpush.msrb.mxu2 %v2122_v26  ;;  %889 = vmatpush.msrb.mxu3 %v2120_v25  ;;  %v3210_v25 = vld [vmem:[#allocation26_spill] sm:$0xff]  ;;  %v3211_v26 = vld [vmem:[#allocation19_spill] sm:$0xff] }
 0x10b   :  { %830 = vmatpush.msra.mxu0 %v2114_v23  ;;  %850 = vmatpush.msrb.mxu1 %v2116_v24  ;;  %v3208_v23 = vld [vmem:[#allocation21_spill] sm:$0xff] }
 0x10c   :  { %870 = vmatpush.msrb.mxu2 %v2134_v30  ;;  %890 = vmatpush.msrb.mxu3 %v2132_v29  ;;  %v3209_v24 = vld [vmem:[#allocation29_spill] sm:$0xff]  ;;  %v3214_v29 = vld [vmem:[#allocation30_spill] sm:$0xff]  ;;  %v3215_v30 = vld [vmem:[#allocation23_spill] sm:$0xff] }
 0x10d   :  { %831 = vmatpush.msra.mxu0 %v2124_v27  ;;  %851 = vmatpush.msrb.mxu1 %v2127_v28  ;;  %v3212_v27 = vld [vmem:[#allocation25_spill] sm:$0xff]  ;;  %v3213_v28 = vld [vmem:[#allocation32_spill] sm:$0xff] }
 0x10e   :  { %871 = vmatpush.msrb.mxu2 %v2153_v35  ;;  %891 = vmatpush.msrb.mxu3 %v2151_v34  ;;  %v3218_v34 = vld [vmem:[#allocation33_spill] sm:$0xff]  ;;  %v3219_v35 = vld [vmem:[#allocation27_spill] sm:$0xff] }
 0x10f   :  { %832 = vmatpush.msra.mxu0 %v2143_v32  ;;  %852 = vmatpush.msrb.mxu1 %v2146_v33  ;;  %v3216_v32 = vld [vmem:[#allocation28_spill] sm:$0xff]  ;;  %v3217_v33 = vld [vmem:[#allocation34_spill] sm:$0xff] }
 0x110   :  { %872 = vmatpush.msrb.mxu2 %v2165_v39  ;;  %892 = vmatpush.msrb.mxu3 %v2163_v38  ;;  %v3222_v38 = vld [vmem:[#allocation35_spill] sm:$0xff] }
 0x111   :  { %833 = vmatpush.msra.mxu0 %v2157_v36  ;;  %853 = vmatpush.msrb.mxu1 %v2159_v37  ;;  %v3220_v36 = vld [vmem:[#allocation31_spill] sm:$0xff]  ;;  %v3221_v37 = vld [vmem:[#allocation36_spill] sm:$0xff] }
 0x112   :  { %873 = vmatpush.msrb.mxu2 %v2177_v43  ;;  %893 = vmatpush.msrb.mxu3 %v2175_v42  ;;  %v3224_v43 = vld [vmem:[#allocation42_spill] sm:$0xff] }
 0x113   :  { %834 = vmatpush.msra.mxu0 %v2167_v40  ;;  %854 = vmatpush.msrb.mxu1 %v2170_v41  ;;  %v3223_v41 = vld [vmem:[#allocation40_spill] sm:$0xff] }
 0x114   :  { %874 = vmatpush.msrb.mxu2 %v2196_v48  ;;  %894 = vmatpush.msrb.mxu3 %v2194_v47 }
 0x115   :  { %835 = vmatpush.msra.mxu0 %v2186_v45  ;;  %855 = vmatpush.msrb.mxu1 %v2189_v46 }
 0x116   :  { %875 = vmatpush.msrb.mxu2 %v2208_v52  ;;  %895 = vmatpush.msrb.mxu3 %v2206_v51 }
 0x117   :  { %836 = vmatpush.msra.mxu0 %v2200_v49  ;;  %856 = vmatpush.msrb.mxu1 %v2202_v50  ;;  %v3225_v49 = vld [vmem:[#allocation44_spill] sm:$0xff] }
 0x118   :  { %876 = vmatpush.msrb.mxu2 %v2220_v56  ;;  %896 = vmatpush.msrb.mxu3 %v3198_v9 }
 0x119   :  { %837 = vmatpush.msra.mxu0 %v3199_v13  ;;  %857 = vmatpush.msrb.mxu1 %v3200_v14 }
 0x11a   :  { %877 = vmatpush.msrb.mxu2 %v3201_v15  ;;  %897 = vmatpush.msrb.mxu3 %v3202_v16 }
 0x11b   :  { %838 = vmatpush.msra.mxu0 %v3203_v17  ;;  %858 = vmatpush.msrb.mxu1 %v3204_v19 }
 0x11c   :  { %878 = vmatpush.msrb.mxu2 %v3205_v20  ;;  %898 = vmatpush.msrb.mxu3 %v3206_v21 }
 0x11d   :  { %839 = vmatpush.msra.mxu0 %v3207_v22  ;;  %859 = vmatpush.msrb.mxu1 %v3208_v23 }
 0x11e   :  { %879 = vmatpush.msrb.mxu2 %v3209_v24  ;;  %899 = vmatpush.msrb.mxu3 %v3210_v25 }
 0x11f   :  { %840 = vmatpush.msra.mxu0 %v3211_v26  ;;  %860 = vmatpush.msrb.mxu1 %v3212_v27 }
 0x120   :  { %880 = vmatpush.msrb.mxu2 %v3213_v28  ;;  %900 = vmatpush.msrb.mxu3 %v3214_v29 }
 0x121   :  { %841 = vmatpush.msra.mxu0 %v3215_v30  ;;  %861 = vmatpush.msrb.mxu1 %v3216_v32 }
 0x122   :  { %881 = vmatpush.msrb.mxu2 %v3217_v33  ;;  %901 = vmatpush.msrb.mxu3 %v3218_v34 }
 0x123   :  { %842 = vmatpush.msra.mxu0 %v3219_v35  ;;  %862 = vmatpush.msrb.mxu1 %v3220_v36 }
 0x124   :  { %882 = vmatpush.msrb.mxu2 %v3221_v37  ;;  %902 = vmatpush.msrb.mxu3 %v3222_v38 }
 0x180   :  { %v540_v39 = vpop.f32.mrf.mxu0  ;;  %v560_v40 = vpop.f32.mrf.mxu1 }
 0x181   :  { %v603_v42 = vadd.f32 %v540_v39, %v3223_v41  ;;  %v604_v45 = vadd.f32 %v560_v40, %v3224_v43 }
 0x183   :  { %v1677_v46 = vmul.f32 -1.442695, %v603_v42  ;;  %v1678_v47 = vmul.f32 -1.442695, %v604_v45  ;;  %v2607_v45 = vld [vmem:[#allocation3 + $0x1e8] sm:$0xff] }
 0x185   :  { %1729 = vpow2.f32 %v1677_v46  ;;  %v2610_v46 = vld [vmem:[#allocation3 + $0x1f0] sm:$0xff] }
 0x186   :  { %1731 = vpow2.f32 %v1678_v47  ;;  %v2613_v47 = vld [vmem:[#allocation3 + $0x1f8] sm:$0xff] }
 0x187   :  { %v600_v48 = vpop.f32.mrf.mxu3  ;;  %v580_v61 = vpop.f32.mrf.mxu2 }
 0x188   :  { %v606_v50 = vadd.f32 %v600_v48, %v3225_v49  ;;  %v605_v10 = vadd.f32 %v580_v61, %v3226_v31  ;;  %v2616_v48 = vld [vmem:[#allocation3 + $0x1c0] sm:$0xff]  ;;  %v2619_v49 = vld [vmem:[#allocation3 + $0x1c8] sm:$0xff] }
 0x189   :  { %v2640_v61 = vld [vmem:[#allocation3 + $0x180] sm:$0xff] }
 0x18a   :  { %v1679_v51 = vmul.f32 -1.442695, %v606_v50  ;;  %v2622_v50 = vld [vmem:[#allocation3 + $0x1d0] sm:$0xff]  ;;  %v2652_v31 = vld [vmem:[#allocation3 + $0x160] sm:$0xff] }
 0x18b   :  { %v1730_v52 = vpop.eup %1729 }
 0x18c   :  { %v1732_v55 = vpop.eup %1731  ;;  %v610_v56 = vadd.f32 1.0, %v1730_v52  ;;  %1733 = vpow2.f32 %v1679_v51  ;;  %v2625_v51 = vld [vmem:[#allocation3 + $0x1d8] sm:$0xff]  ;;  %v2628_v52 = vld [vmem:[#allocation3 + $0x1a0] sm:$0xff] }
 0x18d   :  { %v629_v18 = vadd.f32 1.0, %v1732_v55  ;;  %v2631_v55 = vld [vmem:[#allocation3 + $0x1a8] sm:$0xff] }
 0x18e   :  { %1735 = vrcp.f32 %v610_v56  ;;  %v622_v0 = vand.u32 2147483648, %v610_v56  ;;  %v620_v1 = vand.u32 2147483647, %v610_v56  ;;  %vm616_vm15 = vweird.f32 %v610_v56 }
 0x18f   :  { %1737 = vrcp.f32 %v629_v18  ;;  %v641_v7 = vand.u32 2147483648, %v629_v18  ;;  %v639_v4 = vand.u32 2147483647, %v629_v18  ;;  %vm635_vm0 = vweird.f32 %v629_v18 }
 0x190   :  { %v623_v57 = vor.u32 1.1754944e-38, %v622_v0  ;;  %vm621_vm3 = vcmp.eq.f32.partialorder %v620_v1, 8.507059e+37  ;;  %v2673_v0 = vld [vmem:[#allocation3 + $0x158] sm:$0xff]  ;;  %v2682_v1 = vld [vmem:[#allocation3 + $0x130] sm:$0xff] }
 0x191   :  { %v642_v9 = vor.u32 1.1754944e-38, %v641_v7  ;;  %vm640_vm4 = vcmp.eq.f32.partialorder %v639_v4, 8.507059e+37  ;;  %v2676_v7 = vld [vmem:[#allocation3 + $0x120] sm:$0xff] }
 0x192   :  { %v1734_v8 = vpop.eup %1733  ;;  %v2688_v4 = vld [vmem:[#allocation3 + $0x100] sm:$0xff] }
 0x193   :  { %v649_v11 = vadd.f32 1.0, %v1734_v8  ;;  %v2643_v8 = vld [vmem:[#allocation3 + $0x188] sm:$0xff] }
 0x194   :  { %v1736_v12 = vpop.eup %1735 }
 0x195   :  { %v1738_v44 = vpop.eup %1737  ;;  %v612_v58 = vmul.f32 %v1736_v12, %v610_v56  ;;  %1739 = vrcp.f32 %v649_v11  ;;  %vm617_vm13 = vweird.f32 %v1736_v12  ;;  %v661_v30 = vand.u32 2147483648, %v649_v11  ;;  %v2634_v56 = vld [vmem:[#allocation3 + $0x1b0] sm:$0xff] }
 0x196   :  { %v631_v62 = vmul.f32 %v1738_v44, %v629_v18  ;;  %1741 = vtanh.f32 %v605_v10  ;;  %vm636_vm14 = vweird.f32 %v1738_v44  ;;  %vm618_vm1 = vmor %vm616_vm15, %vm617_vm13  ;;  %vm655_vm6 = vweird.f32 %v649_v11  ;;  %v2637_v18 = vld [vmem:[#allocation3 + $0x1b8] sm:$0xff]  ;;  %v2655_v10 = vld [vmem:[#allocation3 + $0x168] sm:$0xff] }
 0x197   :  { %v613_v60 = vsub.f32 1.0, %v612_v58  ;;  %vm637_vm2 = vmor %vm635_vm0, %vm636_vm14  ;;  %v659_v35 = vand.u32 2147483647, %v649_v11  ;;  %v662_v40 = vor.u32 1.1754944e-38, %v661_v30  ;;  %v2661_v58 = vld [vmem:[#allocation3 + $0x178] sm:$0xff]  ;;  %v2739_v30 = vld [vmem:[#allocation3 + $0x88] sm:$0xff] }
 0x198   :  { %v632_v59 = vsub.f32 1.0, %v631_v62  ;;  %v2664_v62 = vld [vmem:[#allocation3 + $0x140] sm:$0xff]  ;;  %3234 = vst [vmem:[#allocation24_spill] sm:$0xff] %v2739_v30 }
 0x199   :  { %v614_v5 = vmul.f32 %v1736_v12, %v613_v60  ;;  %vm660_vm8 = vcmp.eq.f32.partialorder %v659_v35, 8.507059e+37  ;;  %v2667_v60 = vld [vmem:[#allocation3 + $0x148] sm:$0xff]  ;;  %v2743_v35 = vld [vmem:[#allocation3 + $0x98] sm:$0xff] }
 0x19a   :  { %v633_v3 = vmul.f32 %v1738_v44, %v632_v59  ;;  %v2670_v59 = vld [vmem:[#allocation3 + $0x150] sm:$0xff]  ;;  %3235 = vst [vmem:[#allocation22_spill] sm:$0xff] %v2743_v35 }
 0x19b   :  { %v1740_v54 = vpop.eup %1739  ;;  %v615_v6 = vadd.f32 %v1736_v12, %v614_v5  ;;  %v2679_v5 = vld [vmem:[#allocation3 + $0x128] sm:$0xff] }
 0x19c   :  { %v634_v2 = vadd.f32 %v1738_v44, %v633_v3  ;;  %v651_v63 = vmul.f32 %v1740_v54, %v649_v11  ;;  %v1742_v14 = vpop.eup %1741  ;;  %vm656_vm5 = vweird.f32 %v1740_v54  ;;  %v2646_v11 = vld [vmem:[#allocation3 + $0x190] sm:$0xff]  ;;  %v2685_v3 = vld [vmem:[#allocation3 + $0x138] sm:$0xff] }
 0x19d   :  { %v619_v13 = vsel %vm618_vm1, %v1736_v12, %v615_v6  ;;  %vm657_vm7 = vmor %vm655_vm6, %vm656_vm5  ;;  %v2649_v12 = vld [vmem:[#allocation3 + $0x198] sm:$0xff]  ;;  %v2694_v6 = vld [vmem:[#allocation3 + $0x110] sm:$0xff] }
 0x19e   :  { %v624_v15 = vsel %vm621_vm3, %v623_v57, %v619_v13  ;;  %v638_v16 = vsel %vm637_vm2, %v1738_v44, %v634_v2  ;;  %v652_v17 = vsub.f32 1.0, %v651_v63  ;;  %v2658_v44 = vld [vmem:[#allocation3 + $0x170] sm:$0xff]  ;;  %v2697_v57 = vld [vmem:[#allocation3 + $0x118] sm:$0xff]  ;;  %v2700_v2 = vld [vmem:[#allocation3 + $0xe0] sm:$0xff] }
 0x19f   :  { %v643_v19 = vsel %vm640_vm4, %v642_v9, %v638_v16  ;;  %v666_v21 = vmul.f32 %v1742_v14, %v624_v15  ;;  %v2703_v63 = vld [vmem:[#allocation3 + $0xe8] sm:$0xff]  ;;  %v2706_v9 = vld [vmem:[#allocation3 + $0xf0] sm:$0xff]  ;;  %v2709_v13 = vld [vmem:[#allocation3 + $0xf8] sm:$0xff] }
 0x1a0   :  { %v665_v22 = vmul.f32 %v643_v19, %v2529_v53  ;;  %v653_v23 = vmul.f32 %v1740_v54, %v652_v17  ;;  %v2604_v53 = vld [vmem:[#allocation3 + $0x1e0] sm:$0xff]  ;;  %v2715_v15 = vld [vmem:[#allocation3 + $0xc8] sm:$0xff]  ;;  %v2718_v16 = vld [vmem:[#allocation3 + $0xd0] sm:$0xff] }
 0x1a1   :  { %v2712_v14 = vld [vmem:[#allocation3 + $0xc0] sm:$0xff]  ;;  %3227 = vst [vmem:[#allocation14_spill] sm:$0xff] %v2718_v16  ;;  %v2721_v17 = vld [vmem:[#allocation3 + $0xd8] sm:$0xff] }
 0x1a2   :  { %v2601_v26 = vadd.f32 %v666_v21, %v665_v22  ;;  %v654_v27 = vadd.f32 %v1740_v54, %v653_v23  ;;  %3228 = vst [vmem:[#allocation12_spill] sm:$0xff] %v2721_v17  ;;  %v2724_v19 = vld [vmem:[#allocation3 + $0xa0] sm:$0xff]  ;;  %v2727_v21 = vld [vmem:[#allocation3 + $0xa8] sm:$0xff]  ;;  %v2730_v22 = vld [vmem:[#allocation3 + $0xb0] sm:$0xff] }
 0x1a3   :  { %3229 = vst [vmem:[#allocation13_spill] sm:$0xff] %v2724_v19  ;;  %v2733_v23 = vld [vmem:[#allocation3 + $0xb8] sm:$0xff] }
 0x1a4   :  { %1743 = vtanh.f32 %v2601_v26  ;;  %v658_v39 = vsel %vm657_vm7, %v1740_v54, %v654_v27  ;;  %v2691_v54 = vld [vmem:[#allocation3 + $0x108] sm:$0xff]  ;;  %3230 = vst [vmem:[#allocation20_spill] sm:$0xff] %v2727_v21  ;;  %v2736_v27 = vld [vmem:[#allocation3 + $0x80] sm:$0xff] }
 0x1a5   :  { %v663_v42 = vsel %vm660_vm8, %v662_v40, %v658_v39  ;;  %3231 = vst [vmem:[#allocation18_spill] sm:$0xff] %v2730_v22  ;;  %v2746_v39 = vld [vmem:[#allocation3 + $0x60] sm:$0xff]  ;;  %v2749_v40 = vld [vmem:[#allocation3 + $0x68] sm:$0xff] }
 0x1a6   :  { %3232 = vst [vmem:[#allocation15_spill] sm:$0xff] %v2733_v23 }
 0x1a7   :  { %3233 = vst [vmem:[#allocation17_spill] sm:$0xff] %v2736_v27 }
 0x1a8   :  { %3236 = vst [vmem:[#allocation16_spill] sm:$0xff] %v2746_v39 }
 0x1a9   :  { %3237 = vst [vmem:[#allocation21_spill] sm:$0xff] %v2749_v40 }
 0x1aa   :  { %v1744_v41 = vpop.eup %1743 }
 0x1ab   :  { %v669_v43 = vmul.f32 %v1744_v41, %v663_v42  ;;  %v2754_v41 = vld [vmem:[#allocation3 + $0x40] sm:$0xff] }
 0x1ac   :  { %3238 = vst [vmem:[#allocation29_spill] sm:$0xff] %v2754_v41  ;;  %v2762_v42 = vld [vmem:[#allocation3 + $0x20] sm:$0xff] }
 0x1ad   :  { %691 = vmatmul.f32.vlgmr.msrb.gmra.mxu0 %v669_v43  ;;  %711 = vmatmul.f32.vlgmr.msra.gmra.mxu1 %v669_v43  ;;  %3240 = vst [vmem:[#allocation19_spill] sm:$0xff] %v2762_v42 }
 0x1ae   :  { %731 = vmatmul.f32.vlgmr.msra.gmra.mxu2 %v669_v43  ;;  %751 = vmatmul.f32.vlgmr.msra.gmra.mxu3 %v669_v43 }
 0x1af   :  { %979 = vmatpush.msrb.mxu0 %v2604_v53  ;;  %999 = vmatpush.msra.mxu1 %v2607_v45 }
 0x1b0   :  { %1019 = vmatpush.msra.mxu2 %v2610_v46  ;;  %1039 = vmatpush.msra.mxu3 %v2613_v47 }
 0x1b1   :  { %980 = vmatpush.msrb.mxu0 %v2616_v48  ;;  %1000 = vmatpush.msra.mxu1 %v2619_v49 }
 0x1b2   :  { %1020 = vmatpush.msra.mxu2 %v2622_v50  ;;  %1040 = vmatpush.msra.mxu3 %v2625_v51 }
 0x1b3   :  { %981 = vmatpush.msrb.mxu0 %v2628_v52  ;;  %1001 = vmatpush.msra.mxu1 %v2631_v55 }
 0x1b4   :  { %1021 = vmatpush.msra.mxu2 %v2634_v56  ;;  %1041 = vmatpush.msra.mxu3 %v2637_v18 }
 0x1b5   :  { %982 = vmatpush.msrb.mxu0 %v2640_v61  ;;  %1002 = vmatpush.msra.mxu1 %v2643_v8 }
 0x1b6   :  { %1022 = vmatpush.msra.mxu2 %v2646_v11  ;;  %1042 = vmatpush.msra.mxu3 %v2649_v12 }
 0x1b7   :  { %983 = vmatpush.msrb.mxu0 %v2652_v31  ;;  %1003 = vmatpush.msra.mxu1 %v2655_v10 }
 0x1b8   :  { %1023 = vmatpush.msra.mxu2 %v2658_v44  ;;  %1043 = vmatpush.msra.mxu3 %v2661_v58 }
 0x1b9   :  { %984 = vmatpush.msrb.mxu0 %v2664_v62  ;;  %1004 = vmatpush.msra.mxu1 %v2667_v60 }
 0x1ba   :  { %1024 = vmatpush.msra.mxu2 %v2670_v59  ;;  %1044 = vmatpush.msra.mxu3 %v2673_v0 }
 0x1bb   :  { %985 = vmatpush.msrb.mxu0 %v2676_v7  ;;  %1005 = vmatpush.msra.mxu1 %v2679_v5 }
 0x1bc   :  { %1025 = vmatpush.msra.mxu2 %v2682_v1  ;;  %1045 = vmatpush.msra.mxu3 %v2685_v3 }
 0x1bd   :  { %986 = vmatpush.msrb.mxu0 %v2688_v4  ;;  %1006 = vmatpush.msra.mxu1 %v2691_v54 }
 0x1be   :  { %1026 = vmatpush.msra.mxu2 %v2694_v6  ;;  %1046 = vmatpush.msra.mxu3 %v2697_v57 }
 0x1bf   :  { %987 = vmatpush.msrb.mxu0 %v2700_v2  ;;  %1007 = vmatpush.msra.mxu1 %v2703_v63 }
 0x1c0   :  { %1027 = vmatpush.msra.mxu2 %v2706_v9  ;;  %1047 = vmatpush.msra.mxu3 %v2709_v13 }
 0x1c1   :  { %988 = vmatpush.msrb.mxu0 %v2712_v14  ;;  %1008 = vmatpush.msra.mxu1 %v2715_v15 }
 0x1c2   :  { %1028 = vmatpush.msra.mxu2 %v2718_v16  ;;  %1048 = vmatpush.msra.mxu3 %v2721_v17 }
 0x1c3   :  { %989 = vmatpush.msrb.mxu0 %v2724_v19  ;;  %1009 = vmatpush.msra.mxu1 %v2727_v21 }
 0x1c4   :  { %1029 = vmatpush.msra.mxu2 %v2730_v22  ;;  %1049 = vmatpush.msra.mxu3 %v2733_v23 }
 0x1c5   :  { %990 = vmatpush.msrb.mxu0 %v2736_v27  ;;  %1010 = vmatpush.msra.mxu1 %v2739_v30 }
 0x1c6   :  { %1030 = vmatpush.msra.mxu2 %v3205_v20  ;;  %1050 = vmatpush.msra.mxu3 %v2743_v35  ;;  %v2757_v20 = vld [vmem:[#allocation3 + $0x48] sm:$0xff] }
 0x1c7   :  { %991 = vmatpush.msrb.mxu0 %v2746_v39  ;;  %1011 = vmatpush.msra.mxu1 %v2749_v40  ;;  %3239 = vst [vmem:[#allocation26_spill] sm:$0xff] %v2757_v20 }
 0x1c8   :  { %1031 = vmatpush.msra.mxu2 %v3209_v24  ;;  %1051 = vmatpush.msra.mxu3 %v3210_v25  ;;  %v2768_v24 = vld [vmem:[#allocation3] sm:$0xff] }
 0x1c9   :  { %992 = vmatpush.msrb.mxu0 %v2754_v41  ;;  %1012 = vmatpush.msra.mxu1 %v2757_v20  ;;  %3241 = vst [vmem:[#allocation25_spill] sm:$0xff] %v2768_v24  ;;  %v3244_v41 = vld [vmem:[#allocation48_spill] sm:$0xff] }
 0x1ca   :  { %1032 = vmatpush.msra.mxu2 %v3213_v28  ;;  %1052 = vmatpush.msra.mxu3 %v3214_v29  ;;  %v3242_v29 = vld [vmem:[#allocation41_spill] sm:$0xff] }
 0x1cb   :  { %993 = vmatpush.msrb.mxu0 %v2762_v42  ;;  %1013 = vmatpush.msra.mxu1 %v3216_v32  ;;  %v3243_v42 = vld [vmem:[#allocation46_spill] sm:$0xff] }
 0x1cc   :  { %1033 = vmatpush.msra.mxu2 %v3217_v33  ;;  %1053 = vmatpush.msra.mxu3 %v3218_v34 }
 0x1cd   :  { %994 = vmatpush.msrb.mxu0 %v2768_v24  ;;  %1014 = vmatpush.msra.mxu1 %v3220_v36 }
 0x1ce   :  { %1034 = vmatpush.msra.mxu2 %v3221_v37  ;;  %1054 = vmatpush.msra.mxu3 %v3222_v38 }
 0x22a   :  { %v692_v25 = vpop.f32.mrf.mxu0  ;;  %v712_v28 = vpop.f32.mrf.mxu1 }
 0x22b   :  { %v755_v43 = vadd.f32 %v692_v25, %v3242_v29  ;;  %v756_v32 = vadd.f32 %v712_v28, %v3243_v42  ;;  %v3245_v42 = vld [vmem:[#allocation47_spill] sm:$0xff] }
 0x22d   :  { %v1680_v20 = vmul.f32 -1.442695, %v755_v43  ;;  %v1681_v33 = vmul.f32 -1.442695, %v756_v32 }
 0x22f   :  { %1745 = vpow2.f32 %v1680_v20 }
 0x230   :  { %1747 = vpow2.f32 %v1681_v33 }
 0x231   :  { %v752_v34 = vpop.f32.mrf.mxu3  ;;  %v732_v38 = vpop.f32.mrf.mxu2 }
 0x232   :  { %v758_v40 = vadd.f32 %v752_v34, %v3244_v41  ;;  %v757_v28 = vadd.f32 %v732_v38, %v3245_v42 }
 0x234   :  { %v1682_v24 = vmul.f32 -1.442695, %v758_v40 }
 0x235   :  { %v1746_v39 = vpop.eup %1745 }
 0x236   :  { %v1748_v36 = vpop.eup %1747  ;;  %v762_v35 = vadd.f32 1.0, %v1746_v39  ;;  %1749 = vpow2.f32 %v1682_v24 }
 0x237   :  { %v781_v37 = vadd.f32 1.0, %v1748_v36 }
 0x238   :  { %1751 = vrcp.f32 %v762_v35  ;;  %v774_v40 = vand.u32 2147483648, %v762_v35  ;;  %v772_v24 = vand.u32 2147483647, %v762_v35  ;;  %vm768_vm11 = vweird.f32 %v762_v35 }
 0x239   :  { %1753 = vrcp.f32 %v781_v37  ;;  %v793_v34 = vand.u32 2147483648, %v781_v37  ;;  %v791_v27 = vand.u32 2147483647, %v781_v37  ;;  %vm787_vm12 = vweird.f32 %v781_v37 }
 0x23a   :  { %v775_v38 = vor.u32 1.1754944e-38, %v774_v40  ;;  %vm773_vm15 = vcmp.eq.f32.partialorder %v772_v24, 8.507059e+37 }
 0x23b   :  { %vm792_vm0 = vcmp.eq.f32.partialorder %v791_v27, 8.507059e+37 }
 0x23c   :  { %v1750_v30 = vpop.eup %1749 }
 0x23d   :  { %v801_v25 = vadd.f32 1.0, %v1750_v30 }
 0x23e   :  { %v1752_v29 = vpop.eup %1751 }
 0x23f   :  { %v1754_v43 = vpop.eup %1753  ;;  %v764_v20 = vmul.f32 %v1752_v29, %v762_v35  ;;  %1755 = vrcp.f32 %v801_v25  ;;  %vm769_vm9 = vweird.f32 %v1752_v29  ;;  %v813_v40 = vand.u32 2147483648, %v801_v25 }
 0x240   :  { %v783_v32 = vmul.f32 %v1754_v43, %v781_v37  ;;  %1757 = vtanh.f32 %v757_v28  ;;  %vm788_vm10 = vweird.f32 %v1754_v43  ;;  %vm770_vm13 = vmor %vm768_vm11, %vm769_vm9  ;;  %vm807_vm2 = vweird.f32 %v801_v25 }
 0x241   :  { %v765_v33 = vsub.f32 1.0, %v764_v20  ;;  %vm789_vm14 = vmor %vm787_vm12, %vm788_vm10  ;;  %v794_v20 = vor.u32 1.1754944e-38, %v793_v34  ;;  %v814_v24 = vor.u32 1.1754944e-38, %v813_v40  ;;  %v3264_v40 = vld [vmem:[#allocation19_spill] sm:$0xff] }
 0x242   :  { %v784_v41 = vsub.f32 1.0, %v783_v32 }
 0x243   :  { %v766_v39 = vmul.f32 %v1752_v29, %v765_v33 }
 0x244   :  { %v785_v36 = vmul.f32 %v1754_v43, %v784_v41 }
 0x245   :  { %v1756_v23 = vpop.eup %1755  ;;  %v767_v30 = vadd.f32 %v1752_v29, %v766_v39 }
 0x246   :  { %v786_v42 = vadd.f32 %v1754_v43, %v785_v36  ;;  %v803_v22 = vmul.f32 %v1756_v23, %v801_v25  ;;  %v1758_v28 = vpop.eup %1757  ;;  %vm808_vm1 = vweird.f32 %v1756_v23  ;;  %v3253_v36 = vld [vmem:[#allocation24_spill] sm:$0xff] }
 0x247   :  { %v771_v32 = vsel %vm770_vm13, %v1752_v29, %v767_v30  ;;  %v811_v29 = vand.u32 2147483647, %v801_v25  ;;  %vm809_vm3 = vmor %vm807_vm2, %vm808_vm1  ;;  %v3252_v25 = vld [vmem:[#allocation17_spill] sm:$0xff] }
 0x248   :  { %v776_v21 = vsel %vm773_vm15, %v775_v38, %v771_v32  ;;  %v790_v33 = vsel %vm789_vm14, %v1754_v43, %v786_v42  ;;  %v804_v19 = vsub.f32 1.0, %v803_v22  ;;  %v2828_v30 = vld [vmem:[#allocation3 + $0x90] sm:$0xff]  ;;  %v3255_v38 = vld [vmem:[#allocation22_spill] sm:$0xff]  ;;  %v3256_v42 = vld [vmem:[#allocation16_spill] sm:$0xff] }
 0x249   :  { %v795_v41 = vsel %vm792_vm0, %v794_v20, %v790_v33  ;;  %v818_v17 = vmul.f32 %v1758_v28, %v776_v21  ;;  %vm812_vm4 = vcmp.eq.f32.partialorder %v811_v29, 8.507059e+37  ;;  %v3250_v21 = vld [vmem:[#allocation18_spill] sm:$0xff]  ;;  %3254 = vst [vmem:[#allocation32_spill] sm:$0xff] %v2828_v30  ;;  %v3257_v20 = vld [vmem:[#allocation21_spill] sm:$0xff]  ;;  %v2849_v29 = vld [vmem:[#allocation3 + $0x28] sm:$0xff] }
 0x24a   :  { %v817_v16 = vmul.f32 %v795_v41, %v2601_v26  ;;  %v805_v39 = vmul.f32 %v1756_v23, %v804_v19  ;;  %v3246_v26 = vld [vmem:[#allocation14_spill] sm:$0xff]  ;;  %v3249_v19 = vld [vmem:[#allocation20_spill] sm:$0xff]  ;;  %v2834_v32 = vld [vmem:[#allocation3 + $0x70] sm:$0xff]  ;;  %3265 = vst [vmem:[#allocation33_spill] sm:$0xff] %v2849_v29 }
 0x24b   :  { %3258 = vst [vmem:[#allocation30_spill] sm:$0xff] %v2834_v32  ;;  %v2837_v28 = vld [vmem:[#allocation3 + $0x78] sm:$0xff]  ;;  %v3260_v33 = vld [vmem:[#allocation29_spill] sm:$0xff] }
 0x24c   :  { %v2779_v35 = vadd.f32 %v818_v17, %v817_v16  ;;  %v806_v37 = vadd.f32 %v1756_v23, %v805_v39  ;;  %v3247_v16 = vld [vmem:[#allocation12_spill] sm:$0xff]  ;;  %v3248_v17 = vld [vmem:[#allocation13_spill] sm:$0xff]  ;;  %3259 = vst [vmem:[#allocation23_spill] sm:$0xff] %v2837_v28  ;;  %v3261_v41 = vld [vmem:[#allocation26_spill] sm:$0xff] }
 0x24d   :  { %v2842_v39 = vld [vmem:[#allocation3 + $0x50] sm:$0xff] }
 0x24e   :  { %1759 = vtanh.f32 %v2779_v35  ;;  %v810_v34 = vsel %vm809_vm3, %v1756_v23, %v806_v37  ;;  %v3251_v23 = vld [vmem:[#allocation15_spill] sm:$0xff]  ;;  %3262 = vst [vmem:[#allocation28_spill] sm:$0xff] %v2842_v39  ;;  %v2845_v37 = vld [vmem:[#allocation3 + $0x58] sm:$0xff] }
 0x24f   :  { %v815_v22 = vsel %vm812_vm4, %v814_v24, %v810_v34  ;;  %3263 = vst [vmem:[#allocation34_spill] sm:$0xff] %v2845_v37  ;;  %v2852_v34 = vld [vmem:[#allocation3 + $0x30] sm:$0xff]  ;;  %v2855_v24 = vld [vmem:[#allocation3 + $0x38] sm:$0xff] }
 0x250   :  { %3266 = vst [vmem:[#allocation27_spill] sm:$0xff] %v2852_v34 }
 0x251   :  { %3267 = vst [vmem:[#allocation31_spill] sm:$0xff] %v2855_v24 }
 0x254   :  { %v1760_v27 = vpop.eup %1759 }
 0x255   :  { %v821_v43 = vmul.f32 %v1760_v27, %v815_v22  ;;  %v3268_v27 = vld [vmem:[#allocation25_spill] sm:$0xff]  ;;  %v2859_v22 = vld [vmem:[#allocation3 + $0x8] sm:$0xff] }
 0x256   :  { %3269 = vst [vmem:[#allocation36_spill] sm:$0xff] %v2859_v22 }
 0x257   :  { %843 = vmatmul.f32.vlgmr.msra.gmra.mxu0 %v821_v43  ;;  %863 = vmatmul.f32.vlgmr.msrb.gmra.mxu1 %v821_v43 }
 0x258   :  { %883 = vmatmul.f32.vlgmr.msrb.gmra.mxu2 %v821_v43  ;;  %903 = vmatmul.f32.vlgmr.msrb.gmra.mxu3 %v821_v43  ;;  %v2862_v43 = vld [vmem:[#allocation3 + $0x10] sm:$0xff] }
 0x259   :  { %1131 = vmatpush.msra.mxu0 %v2604_v53  ;;  %1151 = vmatpush.msrb.mxu1 %v2607_v45  ;;  %3270 = vst [vmem:[#allocation35_spill] sm:$0xff] %v2862_v43 }
 0x25a   :  { %1171 = vmatpush.msrb.mxu2 %v2610_v46  ;;  %1191 = vmatpush.msrb.mxu3 %v2613_v47 }
 0x25b   :  { %1132 = vmatpush.msra.mxu0 %v2616_v48  ;;  %1152 = vmatpush.msrb.mxu1 %v2619_v49 }
 0x25c   :  { %1172 = vmatpush.msrb.mxu2 %v2622_v50  ;;  %1192 = vmatpush.msrb.mxu3 %v2625_v51 }
 0x25d   :  { %1133 = vmatpush.msra.mxu0 %v2628_v52  ;;  %1153 = vmatpush.msrb.mxu1 %v2631_v55 }
 0x25e   :  { %1173 = vmatpush.msrb.mxu2 %v2634_v56  ;;  %1193 = vmatpush.msrb.mxu3 %v2637_v18 }
 0x25f   :  { %1134 = vmatpush.msra.mxu0 %v2640_v61  ;;  %1154 = vmatpush.msrb.mxu1 %v2643_v8 }
 0x260   :  { %1174 = vmatpush.msrb.mxu2 %v2646_v11  ;;  %1194 = vmatpush.msrb.mxu3 %v2649_v12 }
 0x261   :  { %1135 = vmatpush.msra.mxu0 %v2652_v31  ;;  %1155 = vmatpush.msrb.mxu1 %v2655_v10 }
 0x262   :  { %1175 = vmatpush.msrb.mxu2 %v2658_v44  ;;  %1195 = vmatpush.msrb.mxu3 %v2661_v58 }
 0x263   :  { %1136 = vmatpush.msra.mxu0 %v2664_v62  ;;  %1156 = vmatpush.msrb.mxu1 %v2667_v60 }
 0x264   :  { %1176 = vmatpush.msrb.mxu2 %v2670_v59  ;;  %1196 = vmatpush.msrb.mxu3 %v2673_v0 }
 0x265   :  { %1137 = vmatpush.msra.mxu0 %v2676_v7  ;;  %1157 = vmatpush.msrb.mxu1 %v2679_v5 }
 0x266   :  { %1177 = vmatpush.msrb.mxu2 %v2682_v1  ;;  %1197 = vmatpush.msrb.mxu3 %v2685_v3 }
 0x267   :  { %1138 = vmatpush.msra.mxu0 %v2688_v4  ;;  %1158 = vmatpush.msrb.mxu1 %v2691_v54 }
 0x268   :  { %1178 = vmatpush.msrb.mxu2 %v2694_v6  ;;  %1198 = vmatpush.msrb.mxu3 %v2697_v57 }
 0x269   :  { %1139 = vmatpush.msra.mxu0 %v2700_v2  ;;  %1159 = vmatpush.msrb.mxu1 %v2703_v63 }
 0x26a   :  { %1179 = vmatpush.msrb.mxu2 %v2706_v9  ;;  %1199 = vmatpush.msrb.mxu3 %v2709_v13 }
 0x26b   :  { %1140 = vmatpush.msra.mxu0 %v2712_v14  ;;  %1160 = vmatpush.msrb.mxu1 %v2715_v15 }
 0x26c   :  { %1180 = vmatpush.msrb.mxu2 %v3246_v26  ;;  %1200 = vmatpush.msrb.mxu3 %v3247_v16 }
 0x26d   :  { %1141 = vmatpush.msra.mxu0 %v3248_v17  ;;  %1161 = vmatpush.msrb.mxu1 %v3249_v19 }
 0x26e   :  { %1181 = vmatpush.msrb.mxu2 %v3250_v21  ;;  %1201 = vmatpush.msrb.mxu3 %v3251_v23 }
 0x26f   :  { %1142 = vmatpush.msra.mxu0 %v3252_v25  ;;  %1162 = vmatpush.msrb.mxu1 %v3253_v36 }
 0x270   :  { %1182 = vmatpush.msrb.mxu2 %v2828_v30  ;;  %1202 = vmatpush.msrb.mxu3 %v3255_v38 }
 0x271   :  { %1143 = vmatpush.msra.mxu0 %v3256_v42  ;;  %1163 = vmatpush.msrb.mxu1 %v3257_v20 }
 0x272   :  { %1183 = vmatpush.msrb.mxu2 %v2834_v32  ;;  %1203 = vmatpush.msrb.mxu3 %v2837_v28 }
 0x273   :  { %1144 = vmatpush.msra.mxu0 %v3260_v33  ;;  %1164 = vmatpush.msrb.mxu1 %v3261_v41  ;;  %v3273_v41 = vld [vmem:[#allocation49_spill] sm:$0xff] }
 0x274   :  { %1184 = vmatpush.msrb.mxu2 %v2842_v39  ;;  %1204 = vmatpush.msrb.mxu3 %v2845_v37  ;;  %v3272_v37 = vld [vmem:[#allocation45_spill] sm:$0xff] }
 0x275   :  { %1145 = vmatpush.msra.mxu0 %v3264_v40  ;;  %1165 = vmatpush.msrb.mxu1 %v2849_v29  ;;  %v2865_v40 = vld [vmem:[#allocation3 + $0x18] sm:$0xff] }
 0x276   :  { %1185 = vmatpush.msrb.mxu2 %v2852_v34  ;;  %1205 = vmatpush.msrb.mxu3 %v2855_v24  ;;  %3271 = vst [vmem:[#allocation40_spill] sm:$0xff] %v2865_v40 }
 0x277   :  { %1146 = vmatpush.msra.mxu0 %v3268_v27  ;;  %1166 = vmatpush.msrb.mxu1 %v2859_v22  ;;  %v3274_v22 = vld [vmem:[#allocation52_spill] sm:$0xff] }
 0x278   :  { %1186 = vmatpush.msrb.mxu2 %v2862_v43  ;;  %1206 = vmatpush.msrb.mxu3 %v2865_v40 }
 0x2d4   :  { %v844_v29 = vpop.f32.mrf.mxu0  ;;  %v864_v34 = vpop.f32.mrf.mxu1 }
 0x2d5   :  { %v907_v39 = vadd.f32 %v844_v29, %v3272_v37  ;;  %v908_v24 = vadd.f32 %v864_v34, %v3273_v41  ;;  %v3275_v41 = vld [vmem:[#allocation51_spill] sm:$0xff] }
 0x2d7   :  { %v1683_v33 = vmul.f32 -1.442695, %v907_v39  ;;  %v1684_v27 = vmul.f32 -1.442695, %v908_v24 }
 0x2d9   :  { %1761 = vpow2.f32 %v1683_v33 }
 0x2da   :  { %1763 = vpow2.f32 %v1684_v27 }
 0x2db   :  { %v904_v28 = vpop.f32.mrf.mxu3  ;;  %v884_v40 = vpop.f32.mrf.mxu2 }
 0x2dc   :  { %v910_v32 = vadd.f32 %v904_v28, %v3274_v22  ;;  %v909_v39 = vadd.f32 %v884_v40, %v3275_v41 }
 0x2de   :  { %v1685_v20 = vmul.f32 -1.442695, %v910_v32 }
 0x2df   :  { %v1762_v42 = vpop.eup %1761 }
 0x2e0   :  { %v1764_v43 = vpop.eup %1763  ;;  %v914_v38 = vadd.f32 1.0, %v1762_v42  ;;  %1765 = vpow2.f32 %v1685_v20 }
 0x2e1   :  { %v933_v30 = vadd.f32 1.0, %v1764_v43 }
 0x2e2   :  { %1767 = vrcp.f32 %v914_v38  ;;  %v926_v32 = vand.u32 2147483648, %v914_v38  ;;  %v924_v20 = vand.u32 2147483647, %v914_v38  ;;  %vm920_vm7 = vweird.f32 %v914_v38 }
 0x2e3   :  { %1769 = vrcp.f32 %v933_v30  ;;  %v945_v22 = vand.u32 2147483648, %v933_v30  ;;  %v943_v25 = vand.u32 2147483647, %v933_v30  ;;  %vm939_vm8 = vweird.f32 %v933_v30 }
 0x2e4   :  { %v927_v40 = vor.u32 1.1754944e-38, %v926_v32  ;;  %vm925_vm11 = vcmp.eq.f32.partialorder %v924_v20, 8.507059e+37 }
 0x2e5   :  { %vm944_vm12 = vcmp.eq.f32.partialorder %v943_v25, 8.507059e+37 }
 0x2e6   :  { %v1766_v36 = vpop.eup %1765 }
 0x2e7   :  { %v953_v37 = vadd.f32 1.0, %v1766_v36 }
 0x2e8   :  { %v1768_v29 = vpop.eup %1767 }
 0x2e9   :  { %v1770_v34 = vpop.eup %1769  ;;  %v916_v33 = vmul.f32 %v1768_v29, %v914_v38  ;;  %1771 = vrcp.f32 %v953_v37  ;;  %vm921_vm5 = vweird.f32 %v1768_v29  ;;  %v965_v32 = vand.u32 2147483648, %v953_v37 }
 0x2ea   :  { %v935_v24 = vmul.f32 %v1770_v34, %v933_v30  ;;  %1773 = vtanh.f32 %v909_v39  ;;  %vm940_vm6 = vweird.f32 %v1770_v34  ;;  %vm922_vm9 = vmor %vm920_vm7, %vm921_vm5  ;;  %vm959_vm14 = vweird.f32 %v953_v37 }
 0x2eb   :  { %v917_v27 = vsub.f32 1.0, %v916_v33  ;;  %vm941_vm10 = vmor %vm939_vm8, %vm940_vm6  ;;  %v946_v33 = vor.u32 1.1754944e-38, %v945_v22  ;;  %v966_v20 = vor.u32 1.1754944e-38, %v965_v32  ;;  %v3294_v32 = vld [vmem:[#allocation19_spill] sm:$0xff] }
 0x2ec   :  { %v936_v28 = vsub.f32 1.0, %v935_v24 }
 0x2ed   :  { %v918_v42 = vmul.f32 %v1768_v29, %v917_v27 }
 0x2ee   :  { %v937_v43 = vmul.f32 %v1770_v34, %v936_v28 }
 0x2ef   :  { %v1772_v23 = vpop.eup %1771  ;;  %v919_v36 = vadd.f32 %v1768_v29, %v918_v42 }
 0x2f0   :  { %v938_v41 = vadd.f32 %v1770_v34, %v937_v43  ;;  %v955_v21 = vmul.f32 %v1772_v23, %v953_v37  ;;  %v1774_v39 = vpop.eup %1773  ;;  %vm960_vm13 = vweird.f32 %v1772_v23  ;;  %v3283_v43 = vld [vmem:[#allocation24_spill] sm:$0xff] }
 0x2f1   :  { %v923_v24 = vsel %vm922_vm9, %v1768_v29, %v919_v36  ;;  %v963_v29 = vand.u32 2147483647, %v953_v37  ;;  %vm961_vm15 = vmor %vm959_vm14, %vm960_vm13  ;;  %v3282_v37 = vld [vmem:[#allocation17_spill] sm:$0xff]  ;;  %v3284_v36 = vld [vmem:[#allocation32_spill] sm:$0xff] }
 0x2f2   :  { %v928_v19 = vsel %vm925_vm11, %v927_v40, %v923_v24  ;;  %v942_v27 = vsel %vm941_vm10, %v1770_v34, %v938_v41  ;;  %v956_v17 = vsub.f32 1.0, %v955_v21  ;;  %v3285_v40 = vld [vmem:[#allocation22_spill] sm:$0xff]  ;;  %v3286_v41 = vld [vmem:[#allocation16_spill] sm:$0xff] }
 0x2f3   :  { %v947_v28 = vsel %vm944_vm12, %v946_v33, %v942_v27  ;;  %v970_v16 = vmul.f32 %v1774_v39, %v928_v19  ;;  %vm964_vm0 = vcmp.eq.f32.partialorder %v963_v29, 8.507059e+37  ;;  %v3280_v19 = vld [vmem:[#allocation18_spill] sm:$0xff]  ;;  %v3287_v33 = vld [vmem:[#allocation21_spill] sm:$0xff]  ;;  %v3289_v39 = vld [vmem:[#allocation23_spill] sm:$0xff] }
 0x2f4   :  { %v969_v26 = vmul.f32 %v947_v28, %v2779_v35  ;;  %v957_v42 = vmul.f32 %v1772_v23, %v956_v17  ;;  %v3276_v35 = vld [vmem:[#allocation14_spill] sm:$0xff]  ;;  %v3279_v17 = vld [vmem:[#allocation20_spill] sm:$0xff]  ;;  %v3290_v27 = vld [vmem:[#allocation29_spill] sm:$0xff] }
 0x2f5   :  { %v3288_v24 = vld [vmem:[#allocation30_spill] sm:$0xff]  ;;  %v3295_v29 = vld [vmem:[#allocation33_spill] sm:$0xff] }
 0x2f6   :  { %v2873_v38 = vadd.f32 %v970_v16, %v969_v26  ;;  %v958_v30 = vadd.f32 %v1772_v23, %v957_v42  ;;  %v3277_v26 = vld [vmem:[#allocation12_spill] sm:$0xff]  ;;  %v3278_v16 = vld [vmem:[#allocation13_spill] sm:$0xff]  ;;  %v3291_v28 = vld [vmem:[#allocation26_spill] sm:$0xff] }
 0x2f7   :  { %v3292_v42 = vld [vmem:[#allocation28_spill] sm:$0xff] }
 0x2f8   :  { %1775 = vtanh.f32 %v2873_v38  ;;  %v962_v22 = vsel %vm961_vm15, %v1772_v23, %v958_v30  ;;  %v3281_v23 = vld [vmem:[#allocation15_spill] sm:$0xff]  ;;  %v3293_v30 = vld [vmem:[#allocation34_spill] sm:$0xff] }
 0x2f9   :  { %v967_v21 = vsel %vm964_vm0, %v966_v20, %v962_v22  ;;  %v3296_v22 = vld [vmem:[#allocation27_spill] sm:$0xff] }
 0x2fa   :  { %v3297_v20 = vld [vmem:[#allocation31_spill] sm:$0xff] }
 0x2fe   :  { %v1776_v25 = vpop.eup %1775 }
 0x2ff   :  { %v973_v34 = vmul.f32 %v1776_v25, %v967_v21  ;;  %v3298_v25 = vld [vmem:[#allocation25_spill] sm:$0xff]  ;;  %v3299_v21 = vld [vmem:[#allocation36_spill] sm:$0xff] }
 0x301   :  { %995 = vmatmul.f32.vlgmr.msrb.gmra.mxu0 %v973_v34  ;;  %1015 = vmatmul.f32.vlgmr.msra.gmra.mxu1 %v973_v34 }
 0x302   :  { %1035 = vmatmul.f32.vlgmr.msra.gmra.mxu2 %v973_v34  ;;  %1055 = vmatmul.f32.vlgmr.msra.gmra.mxu3 %v973_v34  ;;  %v3300_v34 = vld [vmem:[#allocation35_spill] sm:$0xff] }
 0x303   :  { %1283 = vmatpush.msrb.mxu0 %v2604_v53  ;;  %1303 = vmatpush.msra.mxu1 %v2607_v45 }
 0x304   :  { %1323 = vmatpush.msra.mxu2 %v2610_v46  ;;  %1343 = vmatpush.msra.mxu3 %v2613_v47 }
 0x305   :  { %1284 = vmatpush.msrb.mxu0 %v2616_v48  ;;  %1304 = vmatpush.msra.mxu1 %v2619_v49 }
 0x306   :  { %1324 = vmatpush.msra.mxu2 %v2622_v50  ;;  %1344 = vmatpush.msra.mxu3 %v2625_v51 }
 0x307   :  { %1285 = vmatpush.msrb.mxu0 %v2628_v52  ;;  %1305 = vmatpush.msra.mxu1 %v2631_v55 }
 0x308   :  { %1325 = vmatpush.msra.mxu2 %v2634_v56  ;;  %1345 = vmatpush.msra.mxu3 %v2637_v18 }
 0x309   :  { %1286 = vmatpush.msrb.mxu0 %v2640_v61  ;;  %1306 = vmatpush.msra.mxu1 %v2643_v8 }
 0x30a   :  { %1326 = vmatpush.msra.mxu2 %v2646_v11  ;;  %1346 = vmatpush.msra.mxu3 %v2649_v12 }
 0x30b   :  { %1287 = vmatpush.msrb.mxu0 %v2652_v31  ;;  %1307 = vmatpush.msra.mxu1 %v2655_v10 }
 0x30c   :  { %1327 = vmatpush.msra.mxu2 %v2658_v44  ;;  %1347 = vmatpush.msra.mxu3 %v2661_v58 }
 0x30d   :  { %1288 = vmatpush.msrb.mxu0 %v2664_v62  ;;  %1308 = vmatpush.msra.mxu1 %v2667_v60 }
 0x30e   :  { %1328 = vmatpush.msra.mxu2 %v2670_v59  ;;  %1348 = vmatpush.msra.mxu3 %v2673_v0 }
 0x30f   :  { %1289 = vmatpush.msrb.mxu0 %v2676_v7  ;;  %1309 = vmatpush.msra.mxu1 %v2679_v5 }
 0x310   :  { %1329 = vmatpush.msra.mxu2 %v2682_v1  ;;  %1349 = vmatpush.msra.mxu3 %v2685_v3 }
 0x311   :  { %1290 = vmatpush.msrb.mxu0 %v2688_v4  ;;  %1310 = vmatpush.msra.mxu1 %v2691_v54 }
 0x312   :  { %1330 = vmatpush.msra.mxu2 %v2694_v6  ;;  %1350 = vmatpush.msra.mxu3 %v2697_v57 }
 0x313   :  { %1291 = vmatpush.msrb.mxu0 %v2700_v2  ;;  %1311 = vmatpush.msra.mxu1 %v2703_v63 }
 0x314   :  { %1331 = vmatpush.msra.mxu2 %v2706_v9  ;;  %1351 = vmatpush.msra.mxu3 %v2709_v13 }
 0x315   :  { %1292 = vmatpush.msrb.mxu0 %v2712_v14  ;;  %1312 = vmatpush.msra.mxu1 %v2715_v15 }
 0x316   :  { %1332 = vmatpush.msra.mxu2 %v3276_v35  ;;  %1352 = vmatpush.msra.mxu3 %v3277_v26 }
 0x317   :  { %1293 = vmatpush.msrb.mxu0 %v3278_v16  ;;  %1313 = vmatpush.msra.mxu1 %v3279_v17 }
 0x318   :  { %1333 = vmatpush.msra.mxu2 %v3280_v19  ;;  %1353 = vmatpush.msra.mxu3 %v3281_v23 }
 0x319   :  { %1294 = vmatpush.msrb.mxu0 %v3282_v37  ;;  %1314 = vmatpush.msra.mxu1 %v3283_v43 }
 0x31a   :  { %1334 = vmatpush.msra.mxu2 %v3284_v36  ;;  %1354 = vmatpush.msra.mxu3 %v3285_v40 }
 0x31b   :  { %1295 = vmatpush.msrb.mxu0 %v3286_v41  ;;  %1315 = vmatpush.msra.mxu1 %v3287_v33 }
 0x31c   :  { %1335 = vmatpush.msra.mxu2 %v3288_v24  ;;  %1355 = vmatpush.msra.mxu3 %v3289_v39  ;;  %v3302_v39 = vld [vmem:[#allocation50_spill] sm:$0xff]  ;;  %v3303_v24 = vld [vmem:[#allocation53_spill] sm:$0xff] }
 0x31d   :  { %1296 = vmatpush.msrb.mxu0 %v3290_v27  ;;  %1316 = vmatpush.msra.mxu1 %v3291_v28  ;;  %v3301_v27 = vld [vmem:[#allocation40_spill] sm:$0xff] }
 0x31e   :  { %1336 = vmatpush.msra.mxu2 %v3292_v42  ;;  %1356 = vmatpush.msra.mxu3 %v3293_v30 }
 0x31f   :  { %1297 = vmatpush.msrb.mxu0 %v3294_v32  ;;  %1317 = vmatpush.msra.mxu1 %v3295_v29 }
 0x320   :  { %1337 = vmatpush.msra.mxu2 %v3296_v22  ;;  %1357 = vmatpush.msra.mxu3 %v3297_v20  ;;  %v3304_v20 = vld [vmem:[#allocation55_spill] sm:$0xff] }
 0x321   :  { %1298 = vmatpush.msrb.mxu0 %v3298_v25  ;;  %1318 = vmatpush.msra.mxu1 %v3299_v21 }
 0x322   :  { %1338 = vmatpush.msra.mxu2 %v3300_v34  ;;  %1358 = vmatpush.msra.mxu3 %v3301_v27 }
 0x37e   :  { %v996_v28 = vpop.f32.mrf.mxu0  ;;  %v1016_v42 = vpop.f32.mrf.mxu1 }
 0x37f   :  { %v1059_v30 = vadd.f32 %v996_v28, %v3302_v39  ;;  %v1060_v32 = vadd.f32 %v1016_v42, %v3303_v24  ;;  %v3305_v24 = vld [vmem:[#allocation54_spill] sm:$0xff] }
 0x381   :  { %v1686_v33 = vmul.f32 -1.442695, %v1059_v30  ;;  %v1687_v29 = vmul.f32 -1.442695, %v1060_v32 }
 0x383   :  { %1777 = vpow2.f32 %v1686_v33 }
 0x384   :  { %1779 = vpow2.f32 %v1687_v29 }
 0x385   :  { %v1056_v22 = vpop.f32.mrf.mxu3  ;;  %v1036_v27 = vpop.f32.mrf.mxu2 }
 0x386   :  { %v1062_v41 = vadd.f32 %v1056_v22, %v3304_v20  ;;  %v1061_v42 = vadd.f32 %v1036_v27, %v3305_v24 }
 0x388   :  { %v1688_v25 = vmul.f32 -1.442695, %v1062_v41 }
 0x389   :  { %v1778_v40 = vpop.eup %1777 }
 0x38a   :  { %v1780_v21 = vpop.eup %1779  ;;  %v1066_v36 = vadd.f32 1.0, %v1778_v40  ;;  %1781 = vpow2.f32 %v1688_v25 }
 0x38b   :  { %v1085_v34 = vadd.f32 1.0, %v1780_v21 }
 0x38c   :  { %1783 = vrcp.f32 %v1066_v36  ;;  %v1078_v41 = vand.u32 2147483648, %v1066_v36  ;;  %v1076_v25 = vand.u32 2147483647, %v1066_v36  ;;  %vm1072_vm3 = vweird.f32 %v1066_v36 }
 0x38d   :  { %1785 = vrcp.f32 %v1085_v34  ;;  %v1097_v20 = vand.u32 2147483648, %v1085_v34  ;;  %v1095_v37 = vand.u32 2147483647, %v1085_v34  ;;  %vm1091_vm4 = vweird.f32 %v1085_v34 }
 0x38e   :  { %v1079_v27 = vor.u32 1.1754944e-38, %v1078_v41  ;;  %vm1077_vm7 = vcmp.eq.f32.partialorder %v1076_v25, 8.507059e+37 }
 0x38f   :  { %vm1096_vm8 = vcmp.eq.f32.partialorder %v1095_v37, 8.507059e+37 }
 0x390   :  { %v1782_v43 = vpop.eup %1781 }
 0x391   :  { %v1105_v39 = vadd.f32 1.0, %v1782_v43 }
 0x392   :  { %v1784_v28 = vpop.eup %1783 }
 0x393   :  { %v1786_v30 = vpop.eup %1785  ;;  %v1068_v33 = vmul.f32 %v1784_v28, %v1066_v36  ;;  %1787 = vrcp.f32 %v1105_v39  ;;  %vm1073_vm1 = vweird.f32 %v1784_v28  ;;  %v1117_v41 = vand.u32 2147483648, %v1105_v39 }
 0x394   :  { %v1087_v32 = vmul.f32 %v1786_v30, %v1085_v34  ;;  %1789 = vtanh.f32 %v1061_v42  ;;  %vm1092_vm2 = vweird.f32 %v1786_v30  ;;  %vm1074_vm5 = vmor %vm1072_vm3, %vm1073_vm1  ;;  %vm1111_vm10 = vweird.f32 %v1105_v39 }
 0x395   :  { %v1069_v29 = vsub.f32 1.0, %v1068_v33  ;;  %vm1093_vm6 = vmor %vm1091_vm4, %vm1092_vm2  ;;  %v1098_v33 = vor.u32 1.1754944e-38, %v1097_v20  ;;  %v1118_v25 = vor.u32 1.1754944e-38, %v1117_v41 }
 0x396   :  { %v1088_v22 = vsub.f32 1.0, %v1087_v32 }
 0x397   :  { %v1070_v40 = vmul.f32 %v1784_v28, %v1069_v29 }
 0x398   :  { %v1089_v21 = vmul.f32 %v1786_v30, %v1088_v22 }
 0x399   :  { %v1788_v23 = vpop.eup %1787  ;;  %v1071_v43 = vadd.f32 %v1784_v28, %v1070_v40 }
 0x39a   :  { %v1090_v24 = vadd.f32 %v1786_v30, %v1089_v21  ;;  %v1107_v19 = vmul.f32 %v1788_v23, %v1105_v39  ;;  %v1790_v42 = vpop.eup %1789  ;;  %vm1112_vm9 = vweird.f32 %v1788_v23 }
 0x39b   :  { %v1075_v32 = vsel %vm1074_vm5, %v1784_v28, %v1071_v43  ;;  %v1115_v28 = vand.u32 2147483647, %v1105_v39  ;;  %vm1113_vm11 = vmor %vm1111_vm10, %vm1112_vm9  ;;  %v3335_v43 = vld [vmem:[#allocation57_spill] sm:$0xff] }
 0x39c   :  { %v1080_v17 = vsel %vm1077_vm7, %v1079_v27, %v1075_v32  ;;  %v1094_v29 = vsel %vm1093_vm6, %v1786_v30, %v1090_v24  ;;  %v1108_v16 = vsub.f32 1.0, %v1107_v19 }
 0x39d   :  { %v1099_v22 = vsel %vm1096_vm8, %v1098_v33, %v1094_v29  ;;  %v1122_v26 = vmul.f32 %v1790_v42, %v1080_v17  ;;  %vm1116_vm12 = vcmp.eq.f32.partialorder %v1115_v28, 8.507059e+37 }
 0x39e   :  { %v1121_v35 = vmul.f32 %v1099_v22, %v2873_v38  ;;  %v1109_v40 = vmul.f32 %v1788_v23, %v1108_v16 }
 0x3a0   :  { %v2945_v36 = vadd.f32 %v1122_v26, %v1121_v35  ;;  %v1110_v34 = vadd.f32 %v1788_v23, %v1109_v40 }
 0x3a2   :  { %1791 = vtanh.f32 %v2945_v36  ;;  %v1114_v20 = vsel %vm1113_vm11, %v1788_v23, %v1110_v34 }
 0x3a3   :  { %v1119_v19 = vsel %vm1116_vm12, %v1118_v25, %v1114_v20 }
 0x3a8   :  { %v1792_v37 = vpop.eup %1791 }
 0x3a9   :  { %v1125_v30 = vmul.f32 %v1792_v37, %v1119_v19 }
 0x3ab   :  { %1147 = vmatmul.f32.vlgmr.msra.gmra.mxu0 %v1125_v30  ;;  %1167 = vmatmul.f32.vlgmr.msrb.gmra.mxu1 %v1125_v30 }
 0x3ac   :  { %1187 = vmatmul.f32.vlgmr.msrb.gmra.mxu2 %v1125_v30  ;;  %1207 = vmatmul.f32.vlgmr.msrb.gmra.mxu3 %v1125_v30 }
 0x3ad   :  { %1435 = vmatpush.msra.mxu0 %v2604_v53  ;;  %1455 = vmatpush.msrb.mxu1 %v2607_v45  ;;  %v3306_v53 = vld [vmem:[#allocation14_spill] sm:$0xff]  ;;  %v3307_v45 = vld [vmem:[#allocation12_spill] sm:$0xff] }
 0x3ae   :  { %1475 = vmatpush.msrb.mxu2 %v2610_v46  ;;  %1495 = vmatpush.msrb.mxu3 %v2613_v47  ;;  %v3308_v46 = vld [vmem:[#allocation13_spill] sm:$0xff]  ;;  %v3309_v47 = vld [vmem:[#allocation20_spill] sm:$0xff] }
 0x3af   :  { %1436 = vmatpush.msra.mxu0 %v2616_v48  ;;  %1456 = vmatpush.msrb.mxu1 %v2619_v49  ;;  %v3310_v48 = vld [vmem:[#allocation18_spill] sm:$0xff]  ;;  %v3311_v49 = vld [vmem:[#allocation15_spill] sm:$0xff] }
 0x3b0   :  { %1476 = vmatpush.msrb.mxu2 %v2622_v50  ;;  %1496 = vmatpush.msrb.mxu3 %v2625_v51  ;;  %v3312_v50 = vld [vmem:[#allocation17_spill] sm:$0xff]  ;;  %v3313_v51 = vld [vmem:[#allocation24_spill] sm:$0xff] }
 0x3b1   :  { %1437 = vmatpush.msra.mxu0 %v2628_v52  ;;  %1457 = vmatpush.msrb.mxu1 %v2631_v55  ;;  %v3314_v52 = vld [vmem:[#allocation32_spill] sm:$0xff]  ;;  %v3315_v55 = vld [vmem:[#allocation22_spill] sm:$0xff] }
 0x3b2   :  { %1477 = vmatpush.msrb.mxu2 %v2634_v56  ;;  %1497 = vmatpush.msrb.mxu3 %v2637_v18  ;;  %v3316_v56 = vld [vmem:[#allocation16_spill] sm:$0xff]  ;;  %v3317_v18 = vld [vmem:[#allocation21_spill] sm:$0xff] }
 0x3b3   :  { %1438 = vmatpush.msra.mxu0 %v2640_v61  ;;  %1458 = vmatpush.msrb.mxu1 %v2643_v8  ;;  %v3318_v61 = vld [vmem:[#allocation30_spill] sm:$0xff]  ;;  %v3319_v8 = vld [vmem:[#allocation23_spill] sm:$0xff] }
 0x3b4   :  { %1478 = vmatpush.msrb.mxu2 %v2646_v11  ;;  %1498 = vmatpush.msrb.mxu3 %v2649_v12  ;;  %v3320_v11 = vld [vmem:[#allocation29_spill] sm:$0xff]  ;;  %v3321_v12 = vld [vmem:[#allocation26_spill] sm:$0xff] }
 0x3b5   :  { %1439 = vmatpush.msra.mxu0 %v2652_v31  ;;  %1459 = vmatpush.msrb.mxu1 %v2655_v10  ;;  %v3322_v31 = vld [vmem:[#allocation28_spill] sm:$0xff]  ;;  %v3323_v10 = vld [vmem:[#allocation34_spill] sm:$0xff] }
 0x3b6   :  { %1479 = vmatpush.msrb.mxu2 %v2658_v44  ;;  %1499 = vmatpush.msrb.mxu3 %v2661_v58  ;;  %v3324_v44 = vld [vmem:[#allocation19_spill] sm:$0xff]  ;;  %v3325_v58 = vld [vmem:[#allocation33_spill] sm:$0xff] }
 0x3b7   :  { %1440 = vmatpush.msra.mxu0 %v2664_v62  ;;  %1460 = vmatpush.msrb.mxu1 %v2667_v60  ;;  %v3326_v62 = vld [vmem:[#allocation27_spill] sm:$0xff] }
 0x3b8   :  { %1480 = vmatpush.msrb.mxu2 %v2670_v59  ;;  %1500 = vmatpush.msrb.mxu3 %v2673_v0  ;;  %v3327_v60 = vld [vmem:[#allocation31_spill] sm:$0xff]  ;;  %v3328_v59 = vld [vmem:[#allocation25_spill] sm:$0xff]  ;;  %v3329_v0 = vld [vmem:[#allocation36_spill] sm:$0xff] }
 0x3b9   :  { %1441 = vmatpush.msra.mxu0 %v2676_v7  ;;  %1461 = vmatpush.msrb.mxu1 %v2679_v5  ;;  %v3330_v7 = vld [vmem:[#allocation35_spill] sm:$0xff]  ;;  %v3331_v5 = vld [vmem:[#allocation40_spill] sm:$0xff] }
 0x3ba   :  { %1481 = vmatpush.msrb.mxu2 %v2682_v1  ;;  %1501 = vmatpush.msrb.mxu3 %v2685_v3 }
 0x3bb   :  { %1442 = vmatpush.msra.mxu0 %v2688_v4  ;;  %1462 = vmatpush.msrb.mxu1 %v2691_v54  ;;  %v3332_v4 = vld [vmem:[#allocation37_spill] sm:$0xff] }
 0x3bc   :  { %1482 = vmatpush.msrb.mxu2 %v2694_v6  ;;  %1502 = vmatpush.msrb.mxu3 %v2697_v57  ;;  %v3333_v6 = vld [vmem:[#allocation56_spill] sm:$0xff] }
 0x3bd   :  { %1443 = vmatpush.msra.mxu0 %v2700_v2  ;;  %1463 = vmatpush.msrb.mxu1 %v2703_v63 }
 0x3be   :  { %1483 = vmatpush.msrb.mxu2 %v2706_v9  ;;  %1503 = vmatpush.msrb.mxu3 %v2709_v13  ;;  %v3334_v13 = vld [vmem:[#allocation58_spill] sm:$0xff] }
 0x3bf   :  { %1444 = vmatpush.msra.mxu0 %v2712_v14  ;;  %1464 = vmatpush.msrb.mxu1 %v2715_v15 }
 0x3c0   :  { %1484 = vmatpush.msrb.mxu2 %v3306_v53  ;;  %1504 = vmatpush.msrb.mxu3 %v3307_v45 }
 0x3c1   :  { %1445 = vmatpush.msra.mxu0 %v3308_v46  ;;  %1465 = vmatpush.msrb.mxu1 %v3309_v47 }
 0x3c2   :  { %1485 = vmatpush.msrb.mxu2 %v3310_v48  ;;  %1505 = vmatpush.msrb.mxu3 %v3311_v49 }
 0x3c3   :  { %1446 = vmatpush.msra.mxu0 %v3312_v50  ;;  %1466 = vmatpush.msrb.mxu1 %v3313_v51 }
 0x3c4   :  { %1486 = vmatpush.msrb.mxu2 %v3314_v52  ;;  %1506 = vmatpush.msrb.mxu3 %v3315_v55 }
 0x3c5   :  { %1447 = vmatpush.msra.mxu0 %v3316_v56  ;;  %1467 = vmatpush.msrb.mxu1 %v3317_v18 }
 0x3c6   :  { %1487 = vmatpush.msrb.mxu2 %v3318_v61  ;;  %1507 = vmatpush.msrb.mxu3 %v3319_v8 }
 0x3c7   :  { %1448 = vmatpush.msra.mxu0 %v3320_v11  ;;  %1468 = vmatpush.msrb.mxu1 %v3321_v12 }
 0x3c8   :  { %1488 = vmatpush.msrb.mxu2 %v3322_v31  ;;  %1508 = vmatpush.msrb.mxu3 %v3323_v10 }
 0x3c9   :  { %1449 = vmatpush.msra.mxu0 %v3324_v44  ;;  %1469 = vmatpush.msrb.mxu1 %v3325_v58 }
 0x3ca   :  { %1489 = vmatpush.msrb.mxu2 %v3326_v62  ;;  %1509 = vmatpush.msrb.mxu3 %v3327_v60  ;;  %v3336_v60 = vld [vmem:[#allocation38_spill] sm:$0xff] }
 0x3cb   :  { %1450 = vmatpush.msra.mxu0 %v3328_v59  ;;  %1470 = vmatpush.msrb.mxu1 %v3329_v0  ;;  %v3337_v0 = vld [vmem:[#allocation59_spill] sm:$0xff] }
 0x3cc   :  { %1490 = vmatpush.msrb.mxu2 %v3330_v7  ;;  %1510 = vmatpush.msrb.mxu3 %v3331_v5 }
 0x428   :  { %v1148_v1 = vpop.f32.mrf.mxu0  ;;  %v1168_v3 = vpop.f32.mrf.mxu1 }
 0x429   :  { %v1211_v54 = vadd.f32 %v1148_v1, %v3332_v4  ;;  %v1212_v57 = vadd.f32 %v1168_v3, %v3333_v6  ;;  %v3338_v4 = vld [vmem:[#allocation61_spill] sm:$0xff] }
 0x42b   :  { %v1689_v2 = vmul.f32 -1.442695, %v1211_v54  ;;  %v1690_v63 = vmul.f32 -1.442695, %v1212_v57 }
 0x42d   :  { %1793 = vpow2.f32 %v1689_v2 }
 0x42e   :  { %1795 = vpow2.f32 %v1690_v63 }
 0x42f   :  { %v1208_v9 = vpop.f32.mrf.mxu3  ;;  %v1188_v17 = vpop.f32.mrf.mxu2 }
 0x430   :  { %v1214_v14 = vadd.f32 %v1208_v9, %v3334_v13  ;;  %v1213_v27 = vadd.f32 %v1188_v17, %v3335_v43 }
 0x432   :  { %v1691_v15 = vmul.f32 -1.442695, %v1214_v14 }
 0x433   :  { %v1794_v38 = vpop.eup %1793 }
 0x434   :  { %v1796_v35 = vpop.eup %1795  ;;  %v1218_v26 = vadd.f32 1.0, %v1794_v38  ;;  %1797 = vpow2.f32 %v1691_v15 }
 0x435   :  { %v1237_v16 = vadd.f32 1.0, %v1796_v35  ;;  %v3339_v35 = vld [vmem:[#allocation60_spill] sm:$0xff] }
 0x436   :  { %1799 = vrcp.f32 %v1218_v26  ;;  %v1230_v22 = vand.u32 2147483648, %v1218_v26  ;;  %v1228_v41 = vand.u32 2147483647, %v1218_v26  ;;  %vm1224_vm15 = vweird.f32 %v1218_v26 }
 0x437   :  { %1801 = vrcp.f32 %v1237_v16  ;;  %v1249_v40 = vand.u32 2147483648, %v1237_v16  ;;  %v1247_v20 = vand.u32 2147483647, %v1237_v16  ;;  %vm1243_vm0 = vweird.f32 %v1237_v16 }
 0x438   :  { %v1231_v19 = vor.u32 1.1754944e-38, %v1230_v22  ;;  %vm1229_vm3 = vcmp.eq.f32.partialorder %v1228_v41, 8.507059e+37 }
 0x439   :  { %v1250_v45 = vor.u32 1.1754944e-38, %v1249_v40  ;;  %vm1248_vm4 = vcmp.eq.f32.partialorder %v1247_v20, 8.507059e+37 }
 0x43a   :  { %v1798_v23 = vpop.eup %1797 }
 0x43b   :  { %v1257_v39 = vadd.f32 1.0, %v1798_v23 }
 0x43c   :  { %v1800_v21 = vpop.eup %1799 }
 0x43d   :  { %v1802_v24 = vpop.eup %1801  ;;  %v1220_v33 = vmul.f32 %v1800_v21, %v1218_v26  ;;  %1803 = vrcp.f32 %v1257_v39  ;;  %vm1225_vm13 = vweird.f32 %v1800_v21  ;;  %v1269_v8 = vand.u32 2147483648, %v1257_v39 }
 0x43e   :  { %v1239_v32 = vmul.f32 %v1802_v24, %v1237_v16  ;;  %1805 = vtanh.f32 %v1213_v27  ;;  %vm1244_vm14 = vweird.f32 %v1802_v24  ;;  %vm1226_vm1 = vmor %vm1224_vm15, %vm1225_vm13  ;;  %vm1263_vm6 = vweird.f32 %v1257_v39 }
 0x43f   :  { %v1221_v42 = vsub.f32 1.0, %v1220_v33  ;;  %vm1245_vm2 = vmor %vm1243_vm0, %vm1244_vm14  ;;  %v1267_v11 = vand.u32 2147483647, %v1257_v39  ;;  %v1270_v31 = vor.u32 1.1754944e-38, %v1269_v8 }
 0x440   :  { %v1240_v29 = vsub.f32 1.0, %v1239_v32 }
 0x441   :  { %v1222_v34 = vmul.f32 %v1800_v21, %v1221_v42  ;;  %vm1268_vm8 = vcmp.eq.f32.partialorder %v1267_v11, 8.507059e+37  ;;  %v1597_v11 = vld [vmem:[#allocation6 + $0x70] sm:$0xff] }
 0x442   :  { %v1241_v28 = vmul.f32 %v1802_v24, %v1240_v29 }
 0x443   :  { %v1804_v25 = vpop.eup %1803  ;;  %v1223_v37 = vadd.f32 %v1800_v21, %v1222_v34 }
 0x444   :  { %v1242_v30 = vadd.f32 %v1802_v24, %v1241_v28  ;;  %v1259_v53 = vmul.f32 %v1804_v25, %v1257_v39  ;;  %v1806_v47 = vpop.eup %1805  ;;  %vm1264_vm5 = vweird.f32 %v1804_v25 }
 0x445   :  { %v1227_v46 = vsel %vm1226_vm1, %v1800_v21, %v1223_v37  ;;  %vm1265_vm7 = vmor %vm1263_vm6, %vm1264_vm5 }
 0x446   :  { %v1232_v48 = vsel %vm1229_vm3, %v1231_v19, %v1227_v46  ;;  %v1246_v49 = vsel %vm1245_vm2, %v1802_v24, %v1242_v30  ;;  %v1260_v50 = vsub.f32 1.0, %v1259_v53 }
 0x447   :  { %v1251_v51 = vsel %vm1248_vm4, %v1250_v45, %v1246_v49  ;;  %v1274_v52 = vmul.f32 %v1806_v47, %v1232_v48 }
 0x448   :  { %v1273_v55 = vmul.f32 %v1251_v51, %v2945_v36  ;;  %v1261_v56 = vmul.f32 %v1804_v25, %v1260_v50 }
 0x44a   :  { %v3017_v18 = vadd.f32 %v1274_v52, %v1273_v55  ;;  %v1262_v61 = vadd.f32 %v1804_v25, %v1261_v56 }
 0x44c   :  { %1807 = vtanh.f32 %v3017_v18  ;;  %v1266_v12 = vsel %vm1265_vm7, %v1804_v25, %v1262_v61 }
 0x44d   :  { %v1271_v44 = vsel %vm1268_vm8, %v1270_v31, %v1266_v12  ;;  %v1596_v12 = vld [vmem:[#allocation6 + $0x68] sm:$0xff]  ;;  %v1595_v31 = vld [vmem:[#allocation6 + $0x60] sm:$0xff] }
 0x452   :  { %v1808_v10 = vpop.eup %1807 }
 0x453   :  { %v1277_v58 = vmul.f32 %v1808_v10, %v1271_v44  ;;  %v1594_v10 = vld [vmem:[#allocation6 + $0x58] sm:$0xff]  ;;  %v1593_v44 = vld [vmem:[#allocation6 + $0x50] sm:$0xff] }
 0x455   :  { %1299 = vmatmul.f32.vlgmr.msrb.gmra.mxu0 %v1277_v58  ;;  %1319 = vmatmul.f32.vlgmr.msra.gmra.mxu1 %v1277_v58 }
 0x456   :  { %1339 = vmatmul.f32.vlgmr.msra.gmra.mxu2 %v1277_v58  ;;  %1359 = vmatmul.f32.vlgmr.msra.gmra.mxu3 %v1277_v58  ;;  %v1592_v58 = vld [vmem:[#allocation6 + $0x48] sm:$0xff] }
 0x4d2   :  { %v1300_v36 = vpop.f32.mrf.mxu0  ;;  %v1320_v62 = vpop.f32.mrf.mxu1 }
 0x4d3   :  { %v1363_v59 = vadd.f32 %v1300_v36, %v3336_v60  ;;  %v1364_v7 = vadd.f32 %v1320_v62, %v3337_v0  ;;  %v1591_v36 = vld [vmem:[#allocation6 + $0x40] sm:$0xff]  ;;  %v1590_v62 = vld [vmem:[#allocation6 + $0x38] sm:$0xff] }
 0x4d4   :  { %v3340_v0 = vld [vmem:[#allocation39_spill] sm:$0xff] }
 0x4d5   :  { %v1692_v5 = vmul.f32 -1.442695, %v1363_v59  ;;  %v1693_v1 = vmul.f32 -1.442695, %v1364_v7 }
 0x4d7   :  { %1809 = vpow2.f32 %v1692_v5  ;;  %v3341_v5 = vld [vmem:[#allocation62_spill] sm:$0xff] }
 0x4d8   :  { %1811 = vpow2.f32 %v1693_v1 }
 0x4d9   :  { %v1360_v3 = vpop.f32.mrf.mxu3  ;;  %v1340_v13 = vpop.f32.mrf.mxu2 }
 0x4da   :  { %v1366_v54 = vadd.f32 %v1360_v3, %v3338_v4  ;;  %v1365_v26 = vadd.f32 %v1340_v13, %v3339_v35  ;;  %v1589_v3 = vld [vmem:[#allocation6 + $0x30] sm:$0xff]  ;;  %v3342_v13 = vld [vmem:[#allocation64_spill] sm:$0xff] }
 0x4dc   :  { %v1694_v6 = vmul.f32 -1.442695, %v1366_v54 }
 0x4dd   :  { %v1810_v57 = vpop.eup %1809 }
 0x4de   :  { %v1812_v2 = vpop.eup %1811  ;;  %v1370_v63 = vadd.f32 1.0, %v1810_v57  ;;  %1813 = vpow2.f32 %v1694_v6  ;;  %v1588_v6 = vld [vmem:[#allocation6 + $0x28] sm:$0xff]  ;;  %v1587_v57 = vld [vmem:[#allocation6 + $0x20] sm:$0xff] }
 0x4df   :  { %v1389_v9 = vadd.f32 1.0, %v1812_v2  ;;  %v1586_v2 = vld [vmem:[#allocation6 + $0x18] sm:$0xff] }
 0x4e0   :  { %1815 = vrcp.f32 %v1370_v63  ;;  %v1382_v43 = vand.u32 2147483648, %v1370_v63  ;;  %v1380_v33 = vand.u32 2147483647, %v1370_v63  ;;  %vm1376_vm11 = vweird.f32 %v1370_v63 }
 0x4e1   :  { %1817 = vrcp.f32 %v1389_v9  ;;  %v1401_v27 = vand.u32 2147483648, %v1389_v9  ;;  %v1399_v42 = vand.u32 2147483647, %v1389_v9  ;;  %vm1395_vm12 = vweird.f32 %v1389_v9 }
 0x4e2   :  { %v1383_v40 = vor.u32 1.1754944e-38, %v1382_v43  ;;  %vm1381_vm15 = vcmp.eq.f32.partialorder %v1380_v33, 8.507059e+37 }
 0x4e3   :  { %v1402_v28 = vor.u32 1.1754944e-38, %v1401_v27  ;;  %vm1400_vm0 = vcmp.eq.f32.partialorder %v1399_v42, 8.507059e+37 }
 0x4e4   :  { %v1814_v14 = vpop.eup %1813 }
 0x4e5   :  { %v1409_v15 = vadd.f32 1.0, %v1814_v14 }
 0x4e6   :  { %v1816_v38 = vpop.eup %1815 }
 0x4e7   :  { %v1818_v16 = vpop.eup %1817  ;;  %v1372_v17 = vmul.f32 %v1816_v38, %v1370_v63  ;;  %1819 = vrcp.f32 %v1409_v15  ;;  %vm1377_vm9 = vweird.f32 %v1816_v38  ;;  %v1421_v50 = vand.u32 2147483648, %v1409_v15 }
 0x4e8   :  { %v1391_v23 = vmul.f32 %v1818_v16, %v1389_v9  ;;  %1821 = vtanh.f32 %v1365_v26  ;;  %vm1396_vm10 = vweird.f32 %v1818_v16  ;;  %vm1378_vm13 = vmor %vm1376_vm11, %vm1377_vm9  ;;  %vm1415_vm2 = vweird.f32 %v1409_v15  ;;  %v1585_v9 = vld [vmem:[#allocation6 + $0x10] sm:$0xff]  ;;  %v1583_v26 = vld [vmem:[#allocation6] sm:$0xff] }
 0x4e9   :  { %v1373_v39 = vsub.f32 1.0, %v1372_v17  ;;  %vm1397_vm14 = vmor %vm1395_vm12, %vm1396_vm10  ;;  %v1419_v51 = vand.u32 2147483647, %v1409_v15  ;;  %v1422_v55 = vor.u32 1.1754944e-38, %v1421_v50 }
 0x4ea   :  { %v1392_v21 = vsub.f32 1.0, %v1391_v23 }
 0x4eb   :  { %v1374_v24 = vmul.f32 %v1816_v38, %v1373_v39  ;;  %vm1420_vm4 = vcmp.eq.f32.partialorder %v1419_v51, 8.507059e+37 }
 0x4ec   :  { %v1393_v32 = vmul.f32 %v1818_v16, %v1392_v21 }
 0x4ed   :  { %v1820_v29 = vpop.eup %1819  ;;  %v1375_v22 = vadd.f32 %v1816_v38, %v1374_v24  ;;  %v3343_v24 = vld [vmem:[#allocation63_spill] sm:$0xff] }
 0x4ee   :  { %v1394_v34 = vadd.f32 %v1818_v16, %v1393_v32  ;;  %v1411_v41 = vmul.f32 %v1820_v29, %v1409_v15  ;;  %v1822_v25 = vpop.eup %1821  ;;  %vm1416_vm1 = vweird.f32 %v1820_v29  ;;  %v1584_v15 = vld [vmem:[#allocation6 + $0x8] sm:$0xff] }
 0x4ef   :  { %v1379_v20 = vsel %vm1378_vm13, %v1816_v38, %v1375_v22  ;;  %vm1417_vm3 = vmor %vm1415_vm2, %vm1416_vm1 }
 0x4f0   :  { %v1384_v37 = vsel %vm1381_vm15, %v1383_v40, %v1379_v20  ;;  %v1398_v19 = vsel %vm1397_vm14, %v1818_v16, %v1394_v34  ;;  %v1412_v30 = vsub.f32 1.0, %v1411_v41 }
 0x4f1   :  { %v1403_v53 = vsel %vm1400_vm0, %v1402_v28, %v1398_v19  ;;  %v1426_v45 = vmul.f32 %v1822_v25, %v1384_v37 }
 0x4f2   :  { %v1425_v46 = vmul.f32 %v1403_v53, %v3017_v18  ;;  %v1413_v47 = vmul.f32 %v1820_v29, %v1412_v30  ;;  %v1598_v18 = vld [vmem:[#allocation6 + $0x78] sm:$0xff] }
 0x4f3   :  { %1603 = vmatpush.msrb.mxu0 %v1598_v18 }
 0x4f4   :  { %v3025_v48 = vadd.f32 %v1426_v45, %v1425_v46  ;;  %v1414_v49 = vadd.f32 %v1820_v29, %v1413_v47 }
 0x4f5   :  { %1604 = vmatpush.msrb.mxu0 %v1597_v11 }
 0x4f6   :  { %1823 = vtanh.f32 %v3025_v48  ;;  %v1418_v52 = vsel %vm1417_vm3, %v1820_v29, %v1414_v49 }
 0x4f7   :  { %v1423_v61 = vsel %vm1420_vm4, %v1422_v55, %v1418_v52  ;;  %1605 = vmatpush.msrb.mxu0 %v1596_v12 }
 0x4f9   :  { %1606 = vmatpush.msrb.mxu0 %v1595_v31 }
 0x4fb   :  { %1607 = vmatpush.msrb.mxu0 %v1594_v10 }
 0x4fc   :  { %v1824_v56 = vpop.eup %1823 }
 0x4fd   :  { %v1429_v8 = vmul.f32 %v1824_v56, %v1423_v61  ;;  %1608 = vmatpush.msrb.mxu0 %v1593_v44 }
 0x4ff   :  { %1451 = vmatmul.f32.vlgmr.msra.gmra.mxu0 %v1429_v8  ;;  %1471 = vmatmul.f32.vlgmr.msrb.gmra.mxu1 %v1429_v8 }
 0x500   :  { %1491 = vmatmul.f32.vlgmr.msrb.gmra.mxu2 %v1429_v8  ;;  %1511 = vmatmul.f32.vlgmr.msrb.gmra.mxu3 %v1429_v8 }
 0x501   :  { %1609 = vmatpush.msrb.mxu0 %v1592_v58 }
 0x503   :  { %1610 = vmatpush.msrb.mxu0 %v1591_v36 }
 0x505   :  { %1611 = vmatpush.msrb.mxu0 %v1590_v62 }
 0x507   :  { %1612 = vmatpush.msrb.mxu0 %v1589_v3 }
 0x509   :  { %1613 = vmatpush.msrb.mxu0 %v1588_v6 }
 0x50b   :  { %1614 = vmatpush.msrb.mxu0 %v1587_v57 }
 0x50d   :  { %1615 = vmatpush.msrb.mxu0 %v1586_v2 }
 0x50f   :  { %1616 = vmatpush.msrb.mxu0 %v1585_v9 }
 0x511   :  { %1617 = vmatpush.msrb.mxu0 %v1584_v15 }
 0x513   :  { %1618 = vmatpush.msrb.mxu0 %v1583_v26 }
 0x57c   :  { %v1452_v60 = vpop.f32.mrf.mxu0  ;;  %v1472_v59 = vpop.f32.mrf.mxu1 }
 0x57d   :  { %v1515_v7 = vadd.f32 %v1452_v60, %v3340_v0  ;;  %v1516_v1 = vadd.f32 %v1472_v59, %v3341_v5 }
 0x57f   :  { %v1695_v4 = vmul.f32 -1.442695, %v1515_v7  ;;  %v1696_v54 = vmul.f32 -1.442695, %v1516_v1 }
 0x581   :  { %1825 = vpow2.f32 %v1695_v4 }
 0x582   :  { %1827 = vpow2.f32 %v1696_v54 }
 0x583   :  { %v1512_v63 = vpop.f32.mrf.mxu3  ;;  %v1492_v39 = vpop.f32.mrf.mxu2 }
 0x584   :  { %v1518_v14 = vadd.f32 %v1512_v63, %v3342_v13  ;;  %v1517_v33 = vadd.f32 %v1492_v39, %v3343_v24 }
 0x586   :  { %v1697_v38 = vmul.f32 -1.442695, %v1518_v14 }
 0x587   :  { %v1826_v35 = vpop.eup %1825 }
 0x588   :  { %v1828_v16 = vpop.eup %1827  ;;  %v1522_v17 = vadd.f32 1.0, %v1826_v35  ;;  %1829 = vpow2.f32 %v1697_v38 }
 0x589   :  { %v1541_v23 = vadd.f32 1.0, %v1828_v16 }
 0x58a   :  { %1831 = vrcp.f32 %v1522_v17  ;;  %v1534_v34 = vand.u32 2147483648, %v1522_v17  ;;  %v1532_v20 = vand.u32 2147483647, %v1522_v17  ;;  %vm1528_vm7 = vweird.f32 %v1522_v17 }
 0x58b   :  { %1833 = vrcp.f32 %v1541_v23  ;;  %v1553_v41 = vand.u32 2147483648, %v1541_v23  ;;  %v1551_v37 = vand.u32 2147483647, %v1541_v23  ;;  %vm1547_vm8 = vweird.f32 %v1541_v23 }
 0x58c   :  { %v1535_v53 = vor.u32 1.1754944e-38, %v1534_v34  ;;  %vm1533_vm11 = vcmp.eq.f32.partialorder %v1532_v20, 8.507059e+37 }
 0x58d   :  { %v1554_v47 = vor.u32 1.1754944e-38, %v1553_v41  ;;  %vm1552_vm12 = vcmp.eq.f32.partialorder %v1551_v37, 8.507059e+37 }
 0x58e   :  { %v1830_v21 = vpop.eup %1829 }
 0x58f   :  { %v1561_v43 = vadd.f32 1.0, %v1830_v21 }
 0x590   :  { %v1832_v27 = vpop.eup %1831 }
 0x591   :  { %v1834_v32 = vpop.eup %1833  ;;  %v1524_v42 = vmul.f32 %v1832_v27, %v1522_v17  ;;  %1835 = vrcp.f32 %v1561_v43  ;;  %vm1529_vm5 = vweird.f32 %v1832_v27  ;;  %v1573_v31 = vand.u32 2147483648, %v1561_v43 }
 0x592   :  { %v1543_v29 = vmul.f32 %v1834_v32, %v1541_v23  ;;  %1837 = vtanh.f32 %v1517_v33  ;;  %vm1548_vm6 = vweird.f32 %v1834_v32  ;;  %vm1530_vm9 = vmor %vm1528_vm7, %vm1529_vm5  ;;  %vm1567_vm14 = vweird.f32 %v1561_v43 }
 0x593   :  { %v1525_v22 = vsub.f32 1.0, %v1524_v42  ;;  %vm1549_vm10 = vmor %vm1547_vm8, %vm1548_vm6  ;;  %v1571_v10 = vand.u32 2147483647, %v1561_v43  ;;  %v1574_v58 = vor.u32 1.1754944e-38, %v1573_v31 }
 0x594   :  { %v1544_v40 = vsub.f32 1.0, %v1543_v29 }
 0x595   :  { %v1526_v28 = vmul.f32 %v1832_v27, %v1525_v22  ;;  %vm1572_vm0 = vcmp.eq.f32.partialorder %v1571_v10, 8.507059e+37 }
 0x596   :  { %v1545_v25 = vmul.f32 %v1834_v32, %v1544_v40 }
 0x597   :  { %v1836_v19 = vpop.eup %1835  ;;  %v1527_v30 = vadd.f32 %v1832_v27, %v1526_v28 }
 0x598   :  { %v1546_v45 = vadd.f32 %v1834_v32, %v1545_v25  ;;  %v1563_v46 = vmul.f32 %v1836_v19, %v1561_v43  ;;  %v1838_v50 = vpop.eup %1837  ;;  %vm1568_vm13 = vweird.f32 %v1836_v19 }
 0x599   :  { %v1531_v49 = vsel %vm1530_vm9, %v1832_v27, %v1527_v30  ;;  %vm1569_vm15 = vmor %vm1567_vm14, %vm1568_vm13 }
 0x59a   :  { %v1536_v51 = vsel %vm1533_vm11, %v1535_v53, %v1531_v49  ;;  %v1550_v52 = vsel %vm1549_vm10, %v1834_v32, %v1546_v45  ;;  %v1564_v55 = vsub.f32 1.0, %v1563_v46 }
 0x59b   :  { %v1555_v56 = vsel %vm1552_vm12, %v1554_v47, %v1550_v52  ;;  %v1578_v61 = vmul.f32 %v1838_v50, %v1536_v51 }
 0x59c   :  { %v1577_v8 = vmul.f32 %v1555_v56, %v3025_v48  ;;  %v1565_v18 = vmul.f32 %v1836_v19, %v1564_v55  ;;  %v1712_v48 = vld [vmem:[%s3044_s5] ss:$0 sm:$0xff] }
 0x59e   :  { %v1579_v11 = vadd.f32 %v1578_v61, %v1577_v8  ;;  %v1566_v12 = vadd.f32 %v1836_v19, %v1565_v18 }
 0x5a0   :  { %1839 = vtanh.f32 %v1579_v11  ;;  %v1570_v44 = vsel %vm1569_vm15, %v1836_v19, %v1566_v12 }
 0x5a1   :  { %v1575_v62 = vsel %vm1572_vm0, %v1574_v58, %v1570_v44 }
 0x5a6   :  { %v1840_v36 = vpop.eup %1839 }
 0x5a7   :  { %v1581_v60 = vmul.f32 %v1840_v36, %v1575_v62 }
 0x5a9   :  { %v1582_v59 = vmax.f32 %v1581_v60, 0.0 }
 0x5ab   :  { %1619 = vmatmul.f32.vlgmr.msrb.gmra.mxu0 %v1582_v59 }
 0x628   :  { %v1620_v0 = vpop.f32.mrf.mxu0 }
 0x629   :  { %v1621_v7 = vadd.f32 %v1712_v48, %v1620_v0 }
 0x62b   :  { %1623 = vst [vmem:[#allocation8] sm:$0xff] %v1621_v7 }
 0x62c   :  { %1634 = dma.vmem_to_hbm [thread:$0]  %s1630_s17, 128, %s1632_s20, [#allocation5]  }
 0x62d   :  { %1981 = dma.done.wait [#allocation5], 128  }
 0x62e   :  { %1982 = vsyncadd [#allocation5], 4294967168 }
 0x62f   :  { %1639 = vsyncpa [#allocation4], 1 }
 0x630   :  { %1640 = vsyncpa [#allocation7], 1 }
 0x631   :  { %1641 = vsyncpa [#allocation5], 1 }

</bundles_post_ra>
